<compile_context>
chip_gen: v5e
topology: v5e:2x2
jax: 0.10.0
libtpu: 0.0.40
codegen_flags: <defaults>
</compile_context>

<pallas_src>
import jax
import jax.numpy as jnp
from jax.experimental import pallas as pl
from jax.experimental.pallas import tpu as pltpu

IMAGE_SIZE = 28 * 28      # 784 (native width — no lane padding for x/out)
MID_SIZE = 100
PZ_SIZE = 40
Z_SIZE = PZ_SIZE // 2     # 20

# Lane-padded internal sizes (hidden activations never touch HBM).
MID_P = 128               # 100 -> 128
Z_P = 128                 # 20  -> 128 (mu half / logvar half of the packed matmul)
EPS_P = 128               # eps streamed lane-dense (zeros beyond lane 20)


def _vae_kernel(x_ref, eps_ref, w1_ref, b1_ref, w2_ref, b2_ref,
                w3_ref, b3_ref, w4_ref, b4_ref,
                out_ref, mu_ref, logvar_ref):
    """Whole VAE forward for one batch tile, fused in VMEM."""

    def dot(a, w_ref):
        # bf16 MXU matmul with f32 accumulation.
        w = w_ref[...]
        return jnp.dot(a.astype(w.dtype), w, preferred_element_type=jnp.float32)

    x = x_ref[...]                                              # (TB, 784) bf16

    # h1 = relu(input_layer(x))
    h1 = jnp.maximum(dot(x, w1_ref) + b1_ref[...], 0.0)         # (TB, 128) f32

    # mu_sigma = relu(middle_layer(h1)) — fused: w2 packs the mu weights in
    # lanes [0, Z_P) and the logvar weights in lanes [Z_P, 2*Z_P), so both
    # halves stay 128-lane aligned (slices below are at vreg boundaries).
    mulv = jnp.maximum(dot(h1, w2_ref) + b2_ref[...], 0.0)      # (TB, 256) f32
    mu = mulv[:, :Z_P]                                          # (TB, 128)
    logvar = mulv[:, Z_P:]                                      # (TB, 128)

    # Narrow (TB, 20) writebacks — only the real columns hit HBM.
    mu_ref[...] = mu[:, :Z_SIZE]
    logvar_ref[...] = logvar[:, :Z_SIZE]

    # Reparameterization: z = eps * exp(0.5 * logvar) + mu.
    # eps is zero beyond lane Z_SIZE and the padded mu/logvar lanes are zero
    # (zero weight columns + zero bias + relu), so z is exactly zero in the
    # padding lanes, matching the zero-padded rows of w3.
    eps = eps_ref[...].astype(jnp.float32)                      # (TB, 128) f32
    z = eps * jnp.exp(0.5 * logvar) + mu                        # (TB, 128) f32

    # h2 = relu(middle_out_layer(z))
    h2 = jnp.maximum(dot(z, w3_ref) + b3_ref[...], 0.0)         # (TB, 128) f32

    # out = sigmoid(output_layer(h2)) — stored bf16 (dominant HBM stream).
    out = jax.nn.sigmoid(dot(h2, w4_ref) + b4_ref[...])         # (TB, 784) f32
    out_ref[...] = out.astype(out_ref.dtype)


def init_params(key):
    """PyTorch-Linear-style init: U(-1/sqrt(fan_in), 1/sqrt(fan_in)).

    Weights are stored as (in_features, out_features), f32, unpadded."""
    def linear(k, fan_in, fan_out):
        kw, kb = jax.random.split(k)
        bound = 1.0 / jnp.sqrt(fan_in)
        w = jax.random.uniform(kw, (fan_in, fan_out), jnp.float32, -bound, bound)
        b = jax.random.uniform(kb, (1, fan_out), jnp.float32, -bound, bound)
        return w, b

    k1, k2, k3, k4 = jax.random.split(key, 4)
    w1, b1 = linear(k1, IMAGE_SIZE, MID_SIZE)      # input_layer
    w2, b2 = linear(k2, MID_SIZE, PZ_SIZE)         # middle_layer
    w3, b3 = linear(k3, Z_SIZE, MID_SIZE)          # middle_out_layer
    w4, b4 = linear(k4, MID_SIZE, IMAGE_SIZE)      # output_layer
    return dict(w1=w1, b1=b1, w2=w2, b2=b2, w3=w3, b3=b3, w4=w4, b4=b4)


def prepare_params(params, weight_dtype=jnp.bfloat16):
    """One-time prep: pad hidden dims to 128 lanes (x/out keep native 784),
    pack the middle layer's mu/logvar halves into one (128, 256) weight, and
    cast weights to bf16 (biases stay f32)."""
    def pad2(a, shape):
        out = jnp.zeros(shape, jnp.float32)
        return out.at[:a.shape[0], :a.shape[1]].set(a)

    w1 = pad2(params["w1"], (IMAGE_SIZE, MID_P)).astype(weight_dtype)   # (784, 128)
    b1 = pad2(params["b1"], (1, MID_P))

    w2 = jnp.zeros((MID_P, 2 * Z_P), jnp.float32)
    w2 = w2.at[:MID_SIZE, :Z_SIZE].set(params["w2"][:, :Z_SIZE])           # mu half
    w2 = w2.at[:MID_SIZE, Z_P:Z_P + Z_SIZE].set(params["w2"][:, Z_SIZE:])  # logvar half
    w2 = w2.astype(weight_dtype)                                           # (128, 256)
    b2 = jnp.zeros((1, 2 * Z_P), jnp.float32)
    b2 = b2.at[:, :Z_SIZE].set(params["b2"][:, :Z_SIZE])
    b2 = b2.at[:, Z_P:Z_P + Z_SIZE].set(params["b2"][:, Z_SIZE:])

    w3 = pad2(params["w3"], (Z_P, MID_P)).astype(weight_dtype)          # (128, 128)
    b3 = pad2(params["b3"], (1, MID_P))
    w4 = pad2(params["w4"], (MID_P, IMAGE_SIZE)).astype(weight_dtype)   # (128, 784)
    b4 = params["b4"].astype(jnp.float32)                               # (1, 784)
    return dict(w1=w1, b1=b1, w2=w2, b2=b2, w3=w3, b3=b3, w4=w4, b4=b4)


def vae_forward(x, padded_params, eps, *, batch_tile=None):
    """x: (B, 784) or (784,), eps: (B, 20) or (20,)
       -> (recon (B, 784) bf16, mu (B, 20) f32, logvar (B, 20) f32)
       (leading dim dropped if x was 1-D)."""
    squeeze = x.ndim == 1
    if squeeze:
        x = x[None, :]
        eps = eps[None, :]
    B = x.shape[0]

    if batch_tile is None:
        # >= 2 grid steps (even where possible — v7x has 2 TensorCores), tile
        # capped at 512 (amortizes ~0.35 us/step; stays well inside v5e's
        # 16 MiB scoped-VMEM default), multiple of 16 for bf16 sublane packing.
        batch_tile = max(16, min(512, 16 * pl.cdiv(B, 32)))
    TB = batch_tile
    assert TB % 16 == 0, "batch tile must be a multiple of 16 (bf16 sublane pack)"
    Bp = pl.cdiv(B, TB) * TB

    # Single-pass cast (+pad only when B is not a tile multiple); no lane pad
    # for x.  eps is lane-padded 20 -> 128 once (tiny stream), cast to bf16.
    x16 = x.astype(jnp.bfloat16)
    e16 = eps.astype(jnp.bfloat16)
    xp = x16 if Bp == B else jnp.pad(x16, ((0, Bp - B), (0, 0)))
    ep = jnp.pad(e16, ((0, Bp - B), (0, EPS_P - Z_SIZE)))

    p = padded_params
    grid = (Bp // TB,)

    def batch_spec(width):
        return pl.BlockSpec((TB, width), lambda i: (i, 0))

    def const_spec(rows, cols):
        # Same block every grid step => stays VMEM-resident (no re-DMA).
        return pl.BlockSpec((rows, cols), lambda i: (0, 0))

    flops = 2 * Bp * (IMAGE_SIZE * MID_P + MID_P * 2 * Z_P
                      + Z_P * MID_P + MID_P * IMAGE_SIZE)
    bytes_accessed = (sum(int(v.size) * v.dtype.itemsize for v in p.values())
                      + int(xp.size) * 2 + int(ep.size) * 2          # bf16 in
                      + Bp * IMAGE_SIZE * 2 + Bp * 2 * Z_SIZE * 4)   # bf16 out + f32 mu/logvar

    out, mu, logvar = pl.pallas_call(
        _vae_kernel,
        out_shape=(
            jax.ShapeDtypeStruct((Bp, IMAGE_SIZE), jnp.bfloat16),
            jax.ShapeDtypeStruct((Bp, Z_SIZE), jnp.float32),
            jax.ShapeDtypeStruct((Bp, Z_SIZE), jnp.float32),
        ),
        grid_spec=pltpu.PrefetchScalarGridSpec(
            num_scalar_prefetch=0,
            grid=grid,
            in_specs=[
                batch_spec(IMAGE_SIZE),            # x tile (bf16, native 784)
                batch_spec(EPS_P),                 # eps tile (bf16)
                const_spec(IMAGE_SIZE, MID_P), const_spec(1, MID_P),       # w1, b1
                const_spec(MID_P, 2 * Z_P), const_spec(1, 2 * Z_P),        # w2, b2 (packed mu|logvar)
                const_spec(Z_P, MID_P), const_spec(1, MID_P),              # w3, b3
                const_spec(MID_P, IMAGE_SIZE), const_spec(1, IMAGE_SIZE),  # w4, b4
            ],
            out_specs=(batch_spec(IMAGE_SIZE),
                       batch_spec(Z_SIZE),
                       batch_spec(Z_SIZE)),
        ),
        compiler_params=pltpu.CompilerParams(
            dimension_semantics=("parallel",)),    # v7x: shard batch tiles over 2 TCs
        cost_estimate=pl.CostEstimate(
            flops=int(flops),
            transcendentals=int(Bp * (Z_P + IMAGE_SIZE)),
            bytes_accessed=int(bytes_accessed)),
    )(xp, ep, p["w1"], p["b1"], p["w2"], p["b2"], p["w3"], p["b3"], p["w4"], p["b4"])

    recon = out[:B]          # bf16; no lane slicing needed (native 784 width)
    mu = mu[:B]
    logvar = logvar[:B]
    if squeeze:
        recon, mu, logvar = recon[0], mu[0], logvar[0]
    return recon, mu, logvar


def vae_forward_ref(x, params, eps):
    """Plain-JAX reference on the UNPADDED params, mirroring the kernel's
    bf16 matmul inputs / bf16-streamed eps with f32 accumulation (so only
    padding, accumulation order and the final bf16 output cast differ)."""
    def dot(a, w):
        return jnp.dot(a.astype(jnp.bfloat16), w.astype(jnp.bfloat16),
                       preferred_element_type=jnp.float32)

    eps = eps.astype(jnp.bfloat16).astype(jnp.float32)   # kernel streams eps as bf16
    h1 = jnp.maximum(dot(x, params["w1"]) + params["b1"], 0.0)
    ms = jnp.maximum(dot(h1, params["w2"]) + params["b2"], 0.0)
    mu, logvar = ms[:, :Z_SIZE], ms[:, Z_SIZE:]
    z = eps * jnp.exp(0.5 * logvar) + mu
    h2 = jnp.maximum(dot(z, params["w3"]) + params["b3"], 0.0)
    out = jax.nn.sigmoid(dot(h2, params["w4"]) + params["b4"])
    return out, mu, logvar


if __name__ == "__main__":
    key = jax.random.PRNGKey(0)
    kp, kx, ke = jax.random.split(key, 3)

    params = init_params(kp)            # f32, unpadded (module-faithful layout)
    pparams = prepare_params(params)    # padded + packed + bf16 (done once)

    B = 32                              # small demo batch -> grid=(2,), TB=16
    x = jax.random.normal(kx, (B, IMAGE_SIZE), jnp.float32)
    # torch.normal(zeros(20), ones(20)) replaced by a deterministic JAX draw per row.
    eps = jax.random.normal(ke, (B, Z_SIZE), jnp.float32)

    recon, mu, logvar = jax.block_until_ready(vae_forward(x, pparams, eps))

    r_ref, mu_ref, lv_ref = vae_forward_ref(x, params, eps)
    assert recon.shape == (B, IMAGE_SIZE) and recon.dtype == jnp.bfloat16
    assert mu.shape == (B, Z_SIZE) and logvar.shape == (B, Z_SIZE)
    # Recon is stored bf16 (bandwidth) -> compare at bf16-level tolerance;
    # mu/logvar stay f32.
    assert jnp.allclose(recon.astype(jnp.float32), r_ref, atol=1e-2, rtol=1e-2)
    assert jnp.allclose(mu, mu_ref, atol=2e-3, rtol=2e-3)
    assert jnp.allclose(logvar, lv_ref, atol=2e-3, rtol=2e-3)

    # Module-parity single-sample path (original forward takes one 784-vector).
    r1, m1, l1 = jax.block_until_ready(vae_forward(x[0], pparams, eps[0]))
    assert r1.shape == (IMAGE_SIZE,) and m1.shape == (Z_SIZE,) and l1.shape == (Z_SIZE,)
    assert jnp.allclose(r1.astype(jnp.float32), r_ref[0], atol=1e-2, rtol=1e-2)

    print("KERNEL_OK")
</pallas_src>

<mosaic_0001>
module attributes {stable_mosaic.version = 11 : i64} {
  func.func @_vae_kernel(%arg0: i32, %arg1: memref<16x784xbf16, #tpu.memory_space<vmem>>, %arg2: memref<16x128xbf16, #tpu.memory_space<vmem>>, %arg3: memref<784x128xbf16, #tpu.memory_space<vmem>>, %arg4: memref<1x128xf32, #tpu.memory_space<vmem>>, %arg5: memref<128x256xbf16, #tpu.memory_space<vmem>>, %arg6: memref<1x256xf32, #tpu.memory_space<vmem>>, %arg7: memref<128x128xbf16, #tpu.memory_space<vmem>>, %arg8: memref<1x128xf32, #tpu.memory_space<vmem>>, %arg9: memref<128x784xbf16, #tpu.memory_space<vmem>>, %arg10: memref<1x784xf32, #tpu.memory_space<vmem>>, %arg11: memref<16x784xbf16, #tpu.memory_space<vmem>>, %arg12: memref<16x20xf32, #tpu.memory_space<vmem>>, %arg13: memref<16x20xf32, #tpu.memory_space<vmem>>) attributes {dimension_semantics = [#tpu.dimension_semantics<parallel>], iteration_bounds = array<i64: 2>, scalar_prefetch = 0 : i64, scratch_operands = 0 : i64, tpu.core_type = #tpu.core_type<tc>, window_params = [{transform_indices = @transform_0, window_bounds = array<i64: 16, 784>}, {transform_indices = @transform_1, window_bounds = array<i64: 16, 128>}, {pipeline_mode = #tpu.pipeline_mode<synchronous>, transform_indices = @transform_2, window_bounds = array<i64: 784, 128>}, {pipeline_mode = #tpu.pipeline_mode<synchronous>, transform_indices = @transform_3, window_bounds = array<i64: 1, 128>}, {pipeline_mode = #tpu.pipeline_mode<synchronous>, transform_indices = @transform_4, window_bounds = array<i64: 128, 256>}, {pipeline_mode = #tpu.pipeline_mode<synchronous>, transform_indices = @transform_5, window_bounds = array<i64: 1, 256>}, {pipeline_mode = #tpu.pipeline_mode<synchronous>, transform_indices = @transform_6, window_bounds = array<i64: 128, 128>}, {pipeline_mode = #tpu.pipeline_mode<synchronous>, transform_indices = @transform_7, window_bounds = array<i64: 1, 128>}, {pipeline_mode = #tpu.pipeline_mode<synchronous>, transform_indices = @transform_8, window_bounds = array<i64: 128, 784>}, {pipeline_mode = #tpu.pipeline_mode<synchronous>, transform_indices = @transform_9, window_bounds = array<i64: 1, 784>}, {transform_indices = @transform_10, window_bounds = array<i64: 16, 784>}, {transform_indices = @transform_11, window_bounds = array<i64: 16, 20>}, {transform_indices = @transform_12, window_bounds = array<i64: 16, 20>}]} {
    %c0 = arith.constant 0 : index
    %c0_0 = arith.constant 0 : index
    %0 = vector.load %arg1[%c0, %c0_0] : memref<16x784xbf16, #tpu.memory_space<vmem>>, vector<16x784xbf16>
    %c0_1 = arith.constant 0 : index
    %c0_2 = arith.constant 0 : index
    %1 = vector.load %arg3[%c0_1, %c0_2] : memref<784x128xbf16, #tpu.memory_space<vmem>>, vector<784x128xbf16>
    %cst = arith.constant dense<0.000000e+00> : vector<16x128xf32>
    %2 = tpu.matmul %0, %1, %cst {dimension_numbers = #tpu.dot_dimension_numbers<[1], [0], [0], [1], [0, 0, 1, 1], [], []>} : vector<16x784xbf16>, vector<784x128xbf16>, vector<16x128xf32> -> vector<16x128xf32>
    %c0_3 = arith.constant 0 : index
    %c0_4 = arith.constant 0 : index
    %3 = vector.load %arg4[%c0_3, %c0_4] : memref<1x128xf32, #tpu.memory_space<vmem>>, vector<1x128xf32>
    %4 = vector.broadcast %3 : vector<1x128xf32> to vector<16x128xf32>
    %5 = arith.addf %2, %4 : vector<16x128xf32>
    %cst_5 = arith.constant 0.000000e+00 : f32
    %6 = vector.broadcast %cst_5 : f32 to vector<16x128xf32>
    %7 = arith.maximumf %5, %6 : vector<16x128xf32>
    %c0_6 = arith.constant 0 : index
    %c0_7 = arith.constant 0 : index
    %8 = vector.load %arg5[%c0_6, %c0_7] : memref<128x256xbf16, #tpu.memory_space<vmem>>, vector<128x256xbf16>
    %9 = arith.truncf %7 : vector<16x128xf32> to vector<16x128xbf16>
    %cst_8 = arith.constant dense<0.000000e+00> : vector<16x256xf32>
    %10 = tpu.matmul %9, %8, %cst_8 {dimension_numbers = #tpu.dot_dimension_numbers<[1], [0], [0], [1], [0, 0, 1, 1], [], []>} : vector<16x128xbf16>, vector<128x256xbf16>, vector<16x256xf32> -> vector<16x256xf32>
    %c0_9 = arith.constant 0 : index
    %c0_10 = arith.constant 0 : index
    %11 = vector.load %arg6[%c0_9, %c0_10] : memref<1x256xf32, #tpu.memory_space<vmem>>, vector<1x256xf32>
    %12 = vector.broadcast %11 : vector<1x256xf32> to vector<16x256xf32>
    %13 = arith.addf %10, %12 : vector<16x256xf32>
    %cst_11 = arith.constant 0.000000e+00 : f32
    %14 = vector.broadcast %cst_11 : f32 to vector<16x256xf32>
    %15 = arith.maximumf %13, %14 : vector<16x256xf32>
    %16 = vector.extract_strided_slice %15 {offsets = [0, 0], sizes = [16, 128], strides = [1, 1]} : vector<16x256xf32> to vector<16x128xf32>
    %17 = vector.extract_strided_slice %15 {offsets = [0, 128], sizes = [16, 128], strides = [1, 1]} : vector<16x256xf32> to vector<16x128xf32>
    %18 = vector.extract_strided_slice %16 {offsets = [0, 0], sizes = [16, 20], strides = [1, 1]} : vector<16x128xf32> to vector<16x20xf32>
    %c0_12 = arith.constant 0 : index
    %c0_13 = arith.constant 0 : index
    %19 = vector.load %arg12[%c0_12, %c0_13] : memref<16x20xf32, #tpu.memory_space<vmem>>, vector<16x20xf32>
    tpu.vector_store %arg12[%c0_12, %c0_13], %18 {strides = array<i32>} : memref<16x20xf32, #tpu.memory_space<vmem>>, vector<16x20xf32>,
    %20 = vector.extract_strided_slice %17 {offsets = [0, 0], sizes = [16, 20], strides = [1, 1]} : vector<16x128xf32> to vector<16x20xf32>
    %c0_14 = arith.constant 0 : index
    %c0_15 = arith.constant 0 : index
    %21 = vector.load %arg13[%c0_14, %c0_15] : memref<16x20xf32, #tpu.memory_space<vmem>>, vector<16x20xf32>
    tpu.vector_store %arg13[%c0_14, %c0_15], %20 {strides = array<i32>} : memref<16x20xf32, #tpu.memory_space<vmem>>, vector<16x20xf32>,
    %c0_16 = arith.constant 0 : index
    %c0_17 = arith.constant 0 : index
    %22 = vector.load %arg2[%c0_16, %c0_17] : memref<16x128xbf16, #tpu.memory_space<vmem>>, vector<16x128xbf16>
    %23 = arith.extf %22 : vector<16x128xbf16> to vector<16x128xf32>
    %cst_18 = arith.constant 5.000000e-01 : f32
    %24 = vector.broadcast %cst_18 : f32 to vector<16x128xf32>
    %25 = arith.mulf %24, %17 : vector<16x128xf32>
    %26 = math.exp %25 : vector<16x128xf32>
    %27 = arith.mulf %23, %26 : vector<16x128xf32>
    %28 = arith.addf %27, %16 : vector<16x128xf32>
    %c0_19 = arith.constant 0 : index
    %c0_20 = arith.constant 0 : index
    %29 = vector.load %arg7[%c0_19, %c0_20] : memref<128x128xbf16, #tpu.memory_space<vmem>>, vector<128x128xbf16>
    %30 = arith.truncf %28 : vector<16x128xf32> to vector<16x128xbf16>
    %cst_21 = arith.constant dense<0.000000e+00> : vector<16x128xf32>
    %31 = tpu.matmul %30, %29, %cst_21 {dimension_numbers = #tpu.dot_dimension_numbers<[1], [0], [0], [1], [0, 0, 1, 1], [], []>} : vector<16x128xbf16>, vector<128x128xbf16>, vector<16x128xf32> -> vector<16x128xf32>
    %c0_22 = arith.constant 0 : index
    %c0_23 = arith.constant 0 : index
    %32 = vector.load %arg8[%c0_22, %c0_23] : memref<1x128xf32, #tpu.memory_space<vmem>>, vector<1x128xf32>
    %33 = vector.broadcast %32 : vector<1x128xf32> to vector<16x128xf32>
    %34 = arith.addf %31, %33 : vector<16x128xf32>
    %cst_24 = arith.constant 0.000000e+00 : f32
    %35 = vector.broadcast %cst_24 : f32 to vector<16x128xf32>
    %36 = arith.maximumf %34, %35 : vector<16x128xf32>
    %c0_25 = arith.constant 0 : index
    %c0_26 = arith.constant 0 : index
    %37 = vector.load %arg9[%c0_25, %c0_26] : memref<128x784xbf16, #tpu.memory_space<vmem>>, vector<128x784xbf16>
    %38 = arith.truncf %36 : vector<16x128xf32> to vector<16x128xbf16>
    %cst_27 = arith.constant dense<0.000000e+00> : vector<16x784xf32>
    %39 = tpu.matmul %38, %37, %cst_27 {dimension_numbers = #tpu.dot_dimension_numbers<[1], [0], [0], [1], [0, 0, 1, 1], [], []>} : vector<16x128xbf16>, vector<128x784xbf16>, vector<16x784xf32> -> vector<16x784xf32>
    %c0_28 = arith.constant 0 : index
    %c0_29 = arith.constant 0 : index
    %40 = vector.load %arg10[%c0_28, %c0_29] : memref<1x784xf32, #tpu.memory_space<vmem>>, vector<1x784xf32>
    %41 = vector.broadcast %40 : vector<1x784xf32> to vector<16x784xf32>
    %42 = arith.addf %39, %41 : vector<16x784xf32>
    %43 = arith.negf %42 : vector<16x784xf32>
    %44 = math.exp %43 : vector<16x784xf32>
    %cst_30 = arith.constant 1.000000e+00 : f32
    %45 = vector.broadcast %cst_30 : f32 to vector<16x784xf32>
    %46 = arith.addf %45, %44 : vector<16x784xf32>
    %47 = arith.divf %45, %46 : vector<16x784xf32>
    %48 = arith.truncf %47 : vector<16x784xf32> to vector<16x784xbf16>
    %c0_31 = arith.constant 0 : index
    %c0_32 = arith.constant 0 : index
    %49 = vector.load %arg11[%c0_31, %c0_32] : memref<16x784xbf16, #tpu.memory_space<vmem>>, vector<16x784xbf16>
    tpu.vector_store %arg11[%c0_31, %c0_32], %48 {strides = array<i32>} : memref<16x784xbf16, #tpu.memory_space<vmem>>, vector<16x784xbf16>,
    return
  }
  func.func @transform_0(%arg0: i32) -> (i32, i32) {
    %c0_i32 = arith.constant 0 : i32
    %c0_i32_0 = arith.constant 0 : i32
    return %arg0, %c0_i32 : i32, i32
  }
  func.func @transform_1(%arg0: i32) -> (i32, i32) {
    %c0_i32 = arith.constant 0 : i32
    %c0_i32_0 = arith.constant 0 : i32
    return %arg0, %c0_i32 : i32, i32
  }
  func.func @transform_2(%arg0: i32) -> (i32, i32) {
    %c0_i32 = arith.constant 0 : i32
    %c0_i32_0 = arith.constant 0 : i32
    %c0_i32_1 = arith.constant 0 : i32
    return %c0_i32, %c0_i32_0 : i32, i32
  }
  func.func @transform_3(%arg0: i32) -> (i32, i32) {
    %c0_i32 = arith.constant 0 : i32
    %c0_i32_0 = arith.constant 0 : i32
    %c0_i32_1 = arith.constant 0 : i32
    return %c0_i32, %c0_i32_0 : i32, i32
  }
  func.func @transform_4(%arg0: i32) -> (i32, i32) {
    %c0_i32 = arith.constant 0 : i32
    %c0_i32_0 = arith.constant 0 : i32
    %c0_i32_1 = arith.constant 0 : i32
    return %c0_i32, %c0_i32_0 : i32, i32
  }
  func.func @transform_5(%arg0: i32) -> (i32, i32) {
    %c0_i32 = arith.constant 0 : i32
    %c0_i32_0 = arith.constant 0 : i32
    %c0_i32_1 = arith.constant 0 : i32
    return %c0_i32, %c0_i32_0 : i32, i32
  }
  func.func @transform_6(%arg0: i32) -> (i32, i32) {
    %c0_i32 = arith.constant 0 : i32
    %c0_i32_0 = arith.constant 0 : i32
    %c0_i32_1 = arith.constant 0 : i32
    return %c0_i32, %c0_i32_0 : i32, i32
  }
  func.func @transform_7(%arg0: i32) -> (i32, i32) {
    %c0_i32 = arith.constant 0 : i32
    %c0_i32_0 = arith.constant 0 : i32
    %c0_i32_1 = arith.constant 0 : i32
    return %c0_i32, %c0_i32_0 : i32, i32
  }
  func.func @transform_8(%arg0: i32) -> (i32, i32) {
    %c0_i32 = arith.constant 0 : i32
    %c0_i32_0 = arith.constant 0 : i32
    %c0_i32_1 = arith.constant 0 : i32
    return %c0_i32, %c0_i32_0 : i32, i32
  }
  func.func @transform_9(%arg0: i32) -> (i32, i32) {
    %c0_i32 = arith.constant 0 : i32
    %c0_i32_0 = arith.constant 0 : i32
    %c0_i32_1 = arith.constant 0 : i32
    return %c0_i32, %c0_i32_0 : i32, i32
  }
  func.func @transform_10(%arg0: i32) -> (i32, i32) {
    %c0_i32 = arith.constant 0 : i32
    %c0_i32_0 = arith.constant 0 : i32
    return %arg0, %c0_i32 : i32, i32
  }
  func.func @transform_11(%arg0: i32) -> (i32, i32) {
    %c0_i32 = arith.constant 0 : i32
    %c0_i32_0 = arith.constant 0 : i32
    return %arg0, %c0_i32 : i32, i32
  }
  func.func @transform_12(%arg0: i32) -> (i32, i32) {
    %c0_i32 = arith.constant 0 : i32
    %c0_i32_0 = arith.constant 0 : i32
    return %arg0, %c0_i32 : i32, i32
  }
}

</mosaic_0001>

<bundles_post_ra>
// kernel: tpu_custom_call.1
= control target key start
LH: loop header
LB: loop body
LE: loop exit
PB: predicated region body
PF: predicated region fallthrough
CT: control target
= control target key end

     0   :  { %s4140_s0 = inlined_call_operand.vmem [shape: bf16[32,784], index: 0, kind: input, shape index: {}]   ;;  %s4141_s1 = inlined_call_operand.vmem [shape: bf16[32,128], index: 1, kind: input, shape index: {}]   ;;  %s4142_s2 = inlined_call_operand.vmem [shape: bf16[784,128], index: 2, kind: input, shape index: {}]   ;;  %s4143_s3 = inlined_call_operand.vmem [shape: f32[1,128], index: 3, kind: input, shape index: {}]   ;;  %s4144_s4 = inlined_call_operand.vmem [shape: bf16[128,256], index: 4, kind: input, shape index: {}]   ;;  %s4145_s5 = inlined_call_operand.vmem [shape: f32[1,256], index: 5, kind: input, shape index: {}]   ;;  %s4146_s6 = inlined_call_operand.vmem [shape: bf16[128,128], index: 6, kind: input, shape index: {}]   ;;  %s4147_s7 = inlined_call_operand.vmem [shape: f32[1,128], index: 7, kind: input, shape index: {}]   ;;  %s4148_s8 = inlined_call_operand.vmem [shape: bf16[128,784], index: 8, kind: input, shape index: {}]   ;;  %s4149_s9 = inlined_call_operand.vmem [shape: f32[1,784], index: 9, kind: input, shape index: {}]   ;;  %s4150_s10 = inlined_call_operand.hbm [shape: bf16[32,784], index: 10, kind: output, shape index: {0}]   ;;  %s4151_s11 = inlined_call_operand.vmem [shape: f32[32,20], index: 11, kind: output, shape index: {1}]   ;;  %s4152_s12 = inlined_call_operand.vmem [shape: f32[32,20], index: 12, kind: output, shape index: {2}]  }
   0x1   :  { %4157 = sst [smem:[#allocation9_spill]] %s4140_s0 }
   0x2   :  { %18 = vsyncpa [#allocation3], 0 }
   0x3   :  { %20 = vsyncpa [#allocation3 + $0x1], 0  ;;  %s3112_s21 = smov 0   ;;  %s3114_s22 = smov 0  }
   0x4   :  { %s3116_s23 = smov 0   ;;  %s3118_s24 = smov 0  }
   0x5 LB: > { %4158 = sst [smem:[#allocation5_spill]] %s3039_s23  ;;  %s3133_s25 = sadd.s32 4294967295, %s3043_s24   ;;  %s3043_s24 = sphi %s3118_s24, %s4186_s24   ;;  %s3039_s23 = sphi %s3116_s23, %s4188_s23   ;;  %s3035_s22 = sphi %s3114_s22, %s4190_s22   ;;  %s3031_s21 = sphi %s3112_s21, %s4189_s21  }
   0x6   : > { %s2159_s26 = sadd.s32 4294967294, %s3043_s24   ;;  %s3137_s27 = sadd.s32 1, %s3043_s24  }
   0x7   : > { %4159 = sst [smem:[#allocation6_spill]] %s3137_s27  ;;  %s253_s28 = sadd.s32 1, %s3039_s23 }
   0x8   : > { %s250_s29 = ssub.s32 %s3043_s24, %s3137_s27  ;;  %p263_p0 = scmp.ne.s32.totalorder %s3039_s23, %s3035_s22 }
   0x9   : > { %p251_p1 = scmp.eq.s32.totalorder %s250_s29, 0  ;;  %p264_p2 = scmp.eq.s32.totalorder %s3133_s25, 1 }
   0xa   : > { %p269_p3 = scmp.ne.s32.totalorder %s3035_s22, %s3031_s21  ;;  %p270_p4 = scmp.eq.s32.totalorder %s2159_s26, 1 }
   0xb   : > { %s3148_s30 = scalar_select %p251_p1, %s3039_s23, %s253_s28  }
   0xc   : > { %p3150_p5 = por %p264_p2, %p263_p0  ;;  %p3154_p6 = por %p270_p4, %p269_p3 }
   0xd   : > { %4160 = sst [smem:[#allocation7_spill]] %s3148_s30  ;;  %p2162_p7 = scmp.ge.s32.totalorder %s3043_s24, 1 }
   0xe   : > { %s4162_s14 = scalar_select %p3154_p6, 1, 0 }
   0xf   : > { %p383_p8 = scmp.lt.s32.totalorder %s3043_s24, 3 }
  0x10   : > { %4163 = sst [smem:[#allocation8_spill]] %s4162_s14 }
  0x11   : > { %p384_p9 = pnand %p2162_p7, %p383_p8 }
  0x12   : > { %s2163_s19 = sshll.u32 (!%p384_p9), %s3133_s25, 1  ;;  %s4164_s0 = sld [smem:[#allocation9_spill]] (!%p384_p9) }
  0x13   : > { %387 = sbr.rel (%p384_p9) target bundleno = 738 (0x2e2), region = 60  ;;  %p442_p10 = scmp.lt.s32.totalorder (!%p384_p9), %s2163_s19, 3 }
  0x14   : > { %s424_s27 = sand.u32 (!%p384_p9), 1, %s3035_s22  }
  0x15   : > { %s3922_s20 = smul.u32 (!%p384_p9), 56, %s424_s27 }
  0x17   : > { %s3960_s26 = scalar_lea.vmem (!%p384_p9), [#allocation2], %s3922_s20 }
  0x18   : > { %v2749_v0 = vld [vmem:[%s4142_s2 + $0x38] sm:$0xff]  ;;  %v2748_v4 = vld [vmem:[%s4142_s2 + $0x30] sm:$0xff]  ;;  %v2747_v8 = vld [vmem:[%s4142_s2 + $0x28] sm:$0xff]  ;;  %s4192_s19 = smov (!%p442_p10, %s2163_s19), 3  ;;  %vm907_vm0 = vcmask 130048   ;;  %vm1146_vm1 = vcmask 162816  }
  0x19   : > { %v2757_v1 = vld [vmem:[%s4142_s2 + $0x78] sm:$0xff]  ;;  %911 = vmatpush.bf16.msra.mxu0 %v2749_v0  ;;  %v2756_v5 = vld [vmem:[%s4142_s2 + $0x70] sm:$0xff]  ;;  %v2755_v9 = vld [vmem:[%s4142_s2 + $0x68] sm:$0xff]  ;;  %s2876_s15 = smul.u32 28, %s4192_s19  ;;  %s2168_s30 = sshll.u32 %s4192_s19, 3 }
  0x1a   : > { %v2765_v2 = vld [vmem:[%s4142_s2 + $0xb8] sm:$0xff]  ;;  %925 = vmatpush.bf16.msra.mxu1 %v2757_v1  ;;  %v2764_v6 = vld [vmem:[%s4142_s2 + $0xb0] sm:$0xff]  ;;  %v2763_v10 = vld [vmem:[%s4142_s2 + $0xa8] sm:$0xff]  ;;  %s3504_s18 = scalar_lea.vmem %s4151_s11, %s2168_s30  ;;  %s3521_s16 = scalar_lea.vmem %s4152_s12, %s2168_s30 }
  0x1b   : > { %v2773_v3 = vld [vmem:[%s4142_s2 + $0xf8] sm:$0xff]  ;;  %939 = vmatpush.bf16.msra.mxu2 %v2765_v2  ;;  %v2772_v7 = vld [vmem:[%s4142_s2 + $0xf0] sm:$0xff]  ;;  %v2771_v11 = vld [vmem:[%s4142_s2 + $0xe8] sm:$0xff]  ;;  %s3251_s14 = scalar_lea.vmem %s4164_s0, %s2876_s15  ;;  %s2166_s17 = sshll.u32 %s4192_s19, 2 }
  0x1c   : > { %953 = vmatpush.bf16.msra.mxu3 %v2773_v3  ;;  %v2746_v12 = vld [vmem:[%s4142_s2 + $0x20] sm:$0xff]  ;;  %v2745_v16 = vld [vmem:[%s4142_s2 + $0x18] sm:$0xff]  ;;  %v2744_v20 = vld [vmem:[%s4142_s2 + $0x10] sm:$0xff]  ;;  %s452_s15 = scalar_lea.vmem %s4141_s1, %s2166_s17  ;;  %s2024_s30 = sshll.u32 %s3960_s26, 4  ;;  %s2025_s30 = int_to_ptr.vmem [resolvable:$true] %s2024_s30 }
  0x1d   : > { %912 = vmatpush.bf16.msra.mxu0 %v2748_v4  ;;  %v2754_v13 = vld [vmem:[%s4142_s2 + $0x60] sm:$0xff]  ;;  %v2753_v17 = vld [vmem:[%s4142_s2 + $0x58] sm:$0xff]  ;;  %v2752_v21 = vld [vmem:[%s4142_s2 + $0x50] sm:$0xff] }
  0x1e   : > { %926 = vmatpush.bf16.msra.mxu1 %v2756_v5  ;;  %v2762_v14 = vld [vmem:[%s4142_s2 + $0xa0] sm:$0xff]  ;;  %v2761_v18 = vld [vmem:[%s4142_s2 + $0x98] sm:$0xff]  ;;  %v2760_v22 = vld [vmem:[%s4142_s2 + $0x90] sm:$0xff] }
  0x1f   : > { %940 = vmatpush.bf16.msra.mxu2 %v2764_v6  ;;  %v2770_v15 = vld [vmem:[%s4142_s2 + $0xe0] sm:$0xff]  ;;  %v2769_v19 = vld [vmem:[%s4142_s2 + $0xd8] sm:$0xff]  ;;  %v2768_v23 = vld [vmem:[%s4142_s2 + $0xd0] sm:$0xff] }
  0x20   : > { %954 = vmatpush.bf16.msra.mxu3 %v2772_v7  ;;  %v2743_v24 = vld [vmem:[%s4142_s2 + $0x8] sm:$0xff]  ;;  %v2742_v28 = vld [vmem:[%s4142_s2] sm:$0xff]  ;;  %v2738_v31 = vld [vmem:[%s3251_s14 + $0x18] sm:$0xf0] }
  0x21   : > { %913 = vmatpush.bf16.msra.mxu0 %v2747_v8  ;;  %v2751_v25 = vld [vmem:[%s4142_s2 + $0x48] sm:$0xff]  ;;  %v2750_v29 = vld [vmem:[%s4142_s2 + $0x40] sm:$0xff]  ;;  %v2781_v34 = vld [vmem:[%s4142_s2 + $0x138] sm:$0xff] }
  0x22   : > { %927 = vmatpush.bf16.msra.mxu1 %v2755_v9  ;;  %v2759_v26 = vld [vmem:[%s4142_s2 + $0x88] sm:$0xff]  ;;  %v2173_v30 = vld [vmem:[%s3251_s14] sm:$0xf]  ;;  %v2735_v32 = vld [vmem:[%s3251_s14 + $0x4] sm:$0xf] }
  0x23   : > { %941 = vmatpush.bf16.msra.mxu2 %v2763_v10  ;;  %v2767_v27 = vld [vmem:[%s4142_s2 + $0xc8] sm:$0xff]  ;;  %v2175_v33 = vld [vmem:[%s3251_s14 + $0x1c] sm:$0xf0]  ;;  %v2789_v35 = vld [vmem:[%s4142_s2 + $0x178] sm:$0xff]  ;;  %v2174_v40 = vor.u32 %v2738_v31, %v2173_v30 }
  0x24   : > { %955 = vmatpush.bf16.msra.mxu3 %v2771_v11  ;;  %v2758_v36 = vld [vmem:[%s4142_s2 + $0x80] sm:$0xff]  ;;  %v2181_v38 = vld [vmem:[%s3251_s14 + $0x8] sm:$0xf]  ;;  %v2736_v41 = vld [vmem:[%s3251_s14 + $0xc] sm:$0xf]  ;;  %v2178_v43 = vor.u32 %v2735_v32, %v2175_v33 }
  0x25   : > { %914 = vmatpush.bf16.msra.mxu0 %v2746_v12  ;;  %v2766_v37 = vld [vmem:[%s4142_s2 + $0xc0] sm:$0xff]  ;;  %v2183_v42 = vld [vmem:[%s3251_s14 + $0x24] sm:$0xf0]  ;;  %v2780_v45 = vld [vmem:[%s4142_s2 + $0x130] sm:$0xff] }
  0x26   : > { %928 = vmatpush.bf16.msra.mxu1 %v2754_v13  ;;  %v2739_v39 = vld [vmem:[%s3251_s14 + $0x20] sm:$0xf0]  ;;  %v2788_v46 = vld [vmem:[%s4142_s2 + $0x170] sm:$0xff]  ;;  %v2186_v48 = vor.u32 %v2736_v41, %v2183_v42  ;;  %v2779_v49 = vld [vmem:[%s4142_s2 + $0x128] sm:$0xff] }
  0x27   : > { %942 = vmatpush.bf16.msra.mxu2 %v2762_v14  ;;  %v2790_v44 = vld [vmem:[%s4142_s2 + $0x180] sm:$0xff]  ;;  %v2182_v47 = vor.u32 %v2739_v39, %v2181_v38  ;;  %v2787_v50 = vld [vmem:[%s4142_s2 + $0x168] sm:$0xff]  ;;  %v2777_v53 = vld [vmem:[%s4142_s2 + $0x118] sm:$0xff] }
  0x28   : > { %956 = vmatpush.bf16.msra.mxu3 %v2770_v15  ;;  %v2778_v51 = vld [vmem:[%s4142_s2 + $0x120] sm:$0xff]  ;;  %v2785_v54 = vld [vmem:[%s4142_s2 + $0x158] sm:$0xff]  ;;  %v2741_v56 = vld [vmem:[%s3251_s14 + $0x30] sm:$0xf0] }
  0x29   : > { %915 = vmatpush.bf16.msra.mxu0 %v2745_v16  ;;  %v2786_v52 = vld [vmem:[%s4142_s2 + $0x160] sm:$0xff]  ;;  %v2197_v55 = vld [vmem:[%s3251_s14 + $0x18] sm:$0xf]  ;;  %v2776_v57 = vld [vmem:[%s4142_s2 + $0x110] sm:$0xff] }
  0x2a   : > { %929 = vmatpush.bf16.msra.mxu1 %v2753_v17  ;;  %v2784_v58 = vld [vmem:[%s4142_s2 + $0x150] sm:$0xff]  ;;  %v2198_v59 = vor.u32 %v2741_v56, %v2197_v55  ;;  %v2775_v60 = vld [vmem:[%s4142_s2 + $0x108] sm:$0xff]  ;;  %v2774_v62 = vld [vmem:[%s4142_s2 + $0x100] sm:$0xff] }
  0x2b   : > { %943 = vmatpush.bf16.msra.mxu2 %v2761_v18  ;;  %v2783_v61 = vld [vmem:[%s4142_s2 + $0x148] sm:$0xff]  ;;  %v2782_v63 = vld [vmem:[%s4142_s2 + $0x140] sm:$0xff]  ;;  %v2189_v0 = vld [vmem:[%s3251_s14 + $0x10] sm:$0xf] }
  0x2c   : > { %957 = vmatpush.bf16.msra.mxu3 %v2769_v19  ;;  %v2740_v1 = vld [vmem:[%s3251_s14 + $0x28] sm:$0xf0]  ;;  %v2737_v2 = vld [vmem:[%s3251_s14 + $0x14] sm:$0xf]  ;;  %v2191_v3 = vld [vmem:[%s3251_s14 + $0x2c] sm:$0xf0] }
  0x2d   : > { %916 = vmatpush.bf16.msra.mxu0 %v2744_v20  ;;  %v2190_v4 = vor.u32 %v2740_v1, %v2189_v0  ;;  %v2194_v5 = vor.u32 %v2737_v2, %v2191_v3  ;;  %v2454_v6 = vld [vmem:[%s4144_s4 + $0x70] sm:$0xf]  ;;  %v2806_v7 = vld [vmem:[%s4144_s4 + $0x74] sm:$0xf0]  ;;  %v2805_v8 = vld [vmem:[%s4144_s4 + $0x74] sm:$0xf] }
  0x2e   : > { %930 = vmatpush.bf16.msra.mxu1 %v2752_v21  ;;  %v2455_v9 = vor.u32 %v2806_v7, %v2454_v6  ;;  %v2456_v10 = vld [vmem:[%s4144_s4 + $0x78] sm:$0xf0]  ;;  %v2446_v12 = vld [vmem:[%s4144_s4 + $0x60] sm:$0xf]  ;;  %v2804_v13 = vld [vmem:[%s4144_s4 + $0x64] sm:$0xf0] }
  0x2f   : > { %944 = vmatpush.bf16.msra.mxu2 %v2760_v22  ;;  %v2459_v11 = vor.u32 %v2805_v8, %v2456_v10  ;;  %v2803_v14 = vld [vmem:[%s4144_s4 + $0x64] sm:$0xf]  ;;  %v2447_v15 = vor.u32 %v2804_v13, %v2446_v12  ;;  %v2448_v16 = vld [vmem:[%s4144_s4 + $0x68] sm:$0xf0]  ;;  %v2438_v18 = vld [vmem:[%s4144_s4 + $0x50] sm:$0xf] }
  0x30   : > { %958 = vmatpush.bf16.msra.mxu3 %v2768_v23  ;;  %v2451_v17 = vor.u32 %v2803_v14, %v2448_v16  ;;  %v2802_v19 = vld [vmem:[%s4144_s4 + $0x54] sm:$0xf0]  ;;  %v2801_v20 = vld [vmem:[%s4144_s4 + $0x54] sm:$0xf]  ;;  %v2440_v22 = vld [vmem:[%s4144_s4 + $0x58] sm:$0xf0] }
  0x31   : > { %917 = vmatpush.bf16.msra.mxu0 %v2743_v24  ;;  %v2439_v21 = vor.u32 %v2802_v19, %v2438_v18  ;;  %v2443_v23 = vor.u32 %v2801_v20, %v2440_v22  ;;  %v2430_v24 = vld [vmem:[%s4144_s4 + $0x40] sm:$0xf]  ;;  %v2422_v30 = vld [vmem:[%s4144_s4 + $0x30] sm:$0xf]  ;;  %v2798_v31 = vld [vmem:[%s4144_s4 + $0x34] sm:$0xf0] }
  0x32   : > { %931 = vmatpush.bf16.msra.mxu1 %v2751_v25  ;;  %v2800_v25 = vld [vmem:[%s4144_s4 + $0x44] sm:$0xf0]  ;;  %v2797_v32 = vld [vmem:[%s4144_s4 + $0x34] sm:$0xf]  ;;  %v2423_v33 = vor.u32 %v2798_v31, %v2422_v30  ;;  %v2795_v38 = vld [vmem:[%s4144_s4 + $0x24] sm:$0xf] }
  0x33   : > { %945 = vmatpush.bf16.msra.mxu2 %v2759_v26  ;;  %v2799_v26 = vld [vmem:[%s4144_s4 + $0x44] sm:$0xf]  ;;  %v2406_v42 = vld [vmem:[%s4144_s4 + $0x10] sm:$0xf]  ;;  %v2400_v55 = vld [vmem:[%s4144_s4 + $0x8] sm:$0xf0] }
  0x34   : > { %959 = vmatpush.bf16.msra.mxu3 %v2767_v27  ;;  %v2431_v27 = vor.u32 %v2800_v25, %v2430_v24  ;;  %v2812_v24 = vld [vmem:[%s4146_s6 + $0x28] sm:$0xff]  ;;  %v2811_v25 = vld [vmem:[%s4146_s6 + $0x20] sm:$0xff]  ;;  %s3001_s14 = scalar_lea.hbm %s4150_s10, 112 }
  0x35   : > { %918 = vmatpush.bf16.msra.mxu0 %v2742_v28  ;;  %v2432_v28 = vld [vmem:[%s4144_s4 + $0x48] sm:$0xf0]  ;;  %v3456_v30 = vld [vmem:[%s4145_s5] sm:$0x3] }
  0x36   : > { %932 = vmatpush.bf16.msra.mxu1 %v2750_v29  ;;  %v2435_v29 = vor.u32 %v2799_v26, %v2432_v28  ;;  %v2810_v26 = vld [vmem:[%s4146_s6 + $0x18] sm:$0xff]  ;;  %v2808_v28 = vld [vmem:[%s4146_s6 + $0x8] sm:$0xff]  ;;  %v1030_v31 = vperm.slane %v3456_v30, 0 }
  0x37   : > { %946 = vmatpush.bf16.msra.mxu2 %v2758_v36  ;;  %v2414_v36 = vld [vmem:[%s4144_s4 + $0x20] sm:$0xf] }
  0x38   : > { %960 = vmatpush.bf16.msra.mxu3 %v2766_v37  ;;  %919 = vmatmul.bf16.vlgmr.msra.gmra.mxu0 %v2174_v40  ;;  %v2796_v37 = vld [vmem:[%s4144_s4 + $0x24] sm:$0xf0]  ;;  %v2416_v40 = vld [vmem:[%s4144_s4 + $0x28] sm:$0xf0] }
  0x39   : > { %967 = vmatpush.bf16.msrb.mxu0 %v2781_v34  ;;  %933 = vmatmul.bf16.vlgmr.msra.gmra.mxu1 %v2178_v43  ;;  %v2424_v34 = vld [vmem:[%s4144_s4 + $0x38] sm:$0xf0]  ;;  %v2415_v39 = vor.u32 %v2796_v37, %v2414_v36  ;;  %v2419_v41 = vor.u32 %v2795_v38, %v2416_v40  ;;  %v2794_v43 = vld [vmem:[%s4144_s4 + $0x14] sm:$0xf0]  ;;  %v2692_v37 = vld [vmem:[%s4148_s8 + $0x1a4] sm:$0xf0] }
  0x3a   : > { %981 = vmatpush.bf16.msrb.mxu1 %v2789_v35  ;;  %947 = vmatmul.bf16.vlgmr.msra.gmra.mxu2 %v2182_v47  ;;  %v2427_v35 = vor.u32 %v2797_v32, %v2424_v34  ;;  %v1031_v32 = vperm.slane %v3456_v30, 1  ;;  %v2867_v34 = vld [vmem:[%s4148_s8 + $0x1a0] sm:$0xf0]  ;;  %v2698_v38 = vld [vmem:[%s4148_s8 + $0x190] sm:$0xf] }
  0x3b   : > { %1002 = vmatpush.bf16.msrb.mxu2 %v2790_v44  ;;  %961 = vmatmul.bf16.vlgmr.msra.gmra.mxu3 %v2186_v48  ;;  %v2793_v44 = vld [vmem:[%s4144_s4 + $0x14] sm:$0xf] }
  0x3c   : > { %1114 = vmatpush.bf16.msrb.mxu3 %v2455_v9 }
  0x3d   : > { %968 = vmatpush.bf16.msrb.mxu0 %v2780_v45  ;;  %v2407_v45 = vor.u32 %v2794_v43, %v2406_v42 }
  0x3e   : > { %982 = vmatpush.bf16.msrb.mxu1 %v2788_v46  ;;  %v2408_v46 = vld [vmem:[%s4144_s4 + $0x18] sm:$0xf0] }
  0x3f   : > { %1128 = vmatpush.bf16.msra.mxu2 %v2459_v11  ;;  %v2411_v47 = vor.u32 %v2793_v44, %v2408_v46  ;;  %v2662_v44 = vld [vmem:[%s4148_s8 + $0x150] sm:$0xf]  ;;  %v2857_v46 = vld [vmem:[%s4148_s8 + $0x154] sm:$0xf] }
  0x40   : > { %1115 = vmatpush.bf16.msrb.mxu3 %v2447_v15 }
  0x41   : > { %969 = vmatpush.bf16.msrb.mxu0 %v2779_v49  ;;  %v2398_v49 = vld [vmem:[%s4144_s4] sm:$0xf] }
  0x42   : > { %983 = vmatpush.bf16.msrb.mxu1 %v2787_v50  ;;  %v2792_v50 = vld [vmem:[%s4144_s4 + $0x4] sm:$0xf0] }
  0x43   : > { %1129 = vmatpush.bf16.msra.mxu2 %v2451_v17 }
  0x44   : > { %1116 = vmatpush.bf16.msrb.mxu3 %v2439_v21 }
  0x45   : > { %970 = vmatpush.bf16.msrb.mxu0 %v2778_v51  ;;  %v2791_v51 = vld [vmem:[%s4144_s4 + $0x4] sm:$0xf] }
  0x46   : > { %984 = vmatpush.bf16.msrb.mxu1 %v2786_v52  ;;  %v2403_v56 = vor.u32 %v2791_v51, %v2400_v55  ;;  %v2670_v51 = vld [vmem:[%s4148_s8 + $0x158] sm:$0xf] }
  0x47   : > { %1130 = vmatpush.bf16.msra.mxu2 %v2443_v23  ;;  %v2813_v23 = vld [vmem:[%s4146_s6 + $0x30] sm:$0xff]  ;;  %v2634_v55 = vld [vmem:[%s4148_s8 + $0x118] sm:$0xf] }
  0x48   : > { %1117 = vmatpush.bf16.msrb.mxu3 %v2431_v27  ;;  %v2809_v27 = vld [vmem:[%s4146_s6 + $0x10] sm:$0xff] }
  0x49   : > { %971 = vmatpush.bf16.msrb.mxu0 %v2777_v53 }
  0x4a   : > { %985 = vmatpush.bf16.msrb.mxu1 %v2785_v54  ;;  %2395 = vmatmul.msk.bf16.vlgmr.msrb.gmra.mxu2 %vm907_vm0, %v2198_v59  ;;  %v2399_v54 = vor.u32 %v2792_v50, %v2398_v49  ;;  %v2664_v50 = vld [vmem:[%s4148_s8 + $0x16c] sm:$0xf0] }
  0x4b   : > { %1131 = vmatpush.bf16.msra.mxu2 %v2435_v29  ;;  %v2807_v29 = vld [vmem:[%s4146_s6] sm:$0xff] }
  0x4c   : > { %1118 = vmatpush.bf16.msrb.mxu3 %v2423_v33  ;;  %v2690_v33 = vld [vmem:[%s4148_s8 + $0x188] sm:$0xf] }
  0x4d   : > { %972 = vmatpush.bf16.msrb.mxu0 %v2776_v57  ;;  %v2919_v57 = vld [vmem:[%s4143_s3] ss:$0 sm:$0xff]  ;;  %v2691_v36 = vor.u32 %v2867_v34, %v2690_v33 }
  0x4e   : > { %986 = vmatpush.bf16.msrb.mxu1 %v2784_v58  ;;  %v2814_v58 = vld [vmem:[%s4146_s6 + $0x38] sm:$0xff] }
  0x4f   : > { %1132 = vmatpush.bf16.msra.mxu2 %v2427_v35  ;;  %v2864_v35 = vld [vmem:[%s4148_s8 + $0x18c] sm:$0xf] }
  0x50   : > { %1119 = vmatpush.bf16.msrb.mxu3 %v2415_v39  ;;  %v2868_v39 = vld [vmem:[%s4148_s8 + $0x1a8] sm:$0xf0]  ;;  %v2695_v42 = vor.u32 %v2864_v35, %v2692_v37  ;;  %v2851_v35 = vld [vmem:[%s4148_s8 + $0x124] sm:$0xf] }
  0x51   : > { %973 = vmatpush.bf16.msrb.mxu0 %v2775_v60  ;;  %v2699_v43 = vor.u32 %v2868_v39, %v2698_v38  ;;  %v2872_v37 = vld [vmem:[%s452_s15] sm:$0xff]   ;;  %s2001_s15 = scalar_lea.sflag [#allocation3], %s424_s27 }
  0x52   : > { %987 = vmatpush.bf16.msrb.mxu1 %v2783_v61 }
  0x53   : > { %1133 = vmatpush.bf16.msra.mxu2 %v2419_v41 }
  0x54   : > { %1120 = vmatpush.bf16.msrb.mxu3 %v2407_v45  ;;  %v2860_v45 = vld [vmem:[%s4148_s8 + $0x168] sm:$0xf0] }
  0x55   : > { %974 = vmatpush.bf16.msrb.mxu0 %v2774_v62  ;;  %v2663_v49 = vor.u32 %v2860_v45, %v2662_v44  ;;  %v2833_v44 = vld [vmem:[%s4148_s8 + $0x90] sm:$0xf0] }
  0x56   : > { %988 = vmatpush.bf16.msrb.mxu1 %v2782_v63 }
  0x57   : > { %1134 = vmatpush.bf16.msra.mxu2 %v2411_v47 }
  0x58   : > { %975 = vmatmul.bf16.vlgmr.msrb.gmra.mxu0 %v2190_v4  ;;  %1121 = vmatpush.bf16.msrb.mxu3 %v2399_v54 }
  0x59   : > { %989 = vmatmul.bf16.vlgmr.msrb.gmra.mxu1 %v2194_v5  ;;  %1234 = vmatpush.bf16.msra.mxu0 %v2814_v58 }
  0x5a   : > { %1619 = vmatpush.bf16.msra.mxu1 %v2691_v36  ;;  %v2644_v36 = vld [vmem:[%s4148_s8 + $0x13c] sm:$0xf0] }
  0x5b   : > { %1135 = vmatpush.bf16.msra.mxu2 %v2403_v56  ;;  %v2853_v56 = vld [vmem:[%s4148_s8 + $0x130] sm:$0xf0]  ;;  %v2647_v45 = vor.u32 %v2851_v35, %v2644_v36  ;;  %v2686_v36 = vld [vmem:[%s4148_s8 + $0x168] sm:$0xf] }
  0x5c   : > { %1633 = vmatpush.bf16.msra.mxu3 %v2695_v42 }
  0x5d   : > { %1235 = vmatpush.bf16.msra.mxu0 %v2813_v23  ;;  %v2580_v23 = vld [vmem:[%s4148_s8 + $0xc4] sm:$0xf0] }
  0x5e   : > { %1620 = vmatpush.bf16.msra.mxu1 %v2663_v49  ;;  %v2616_v49 = vld [vmem:[%s4148_s8 + $0x104] sm:$0xf0] }
  0x5f   : > { %1647 = vmatpush.bf16.msrb.mxu2 %v2699_v43  ;;  %v2558_v43 = vld [vmem:[%s4148_s8 + $0x78] sm:$0xf] }
  0x61   : > { %1236 = vmatpush.bf16.msra.mxu0 %v2812_v24  ;;  %v2858_v24 = vld [vmem:[%s4148_s8 + $0x15c] sm:$0xf] }
  0x65   : > { %1237 = vmatpush.bf16.msra.mxu0 %v2811_v25  ;;  %v2672_v25 = vld [vmem:[%s4148_s8 + $0x174] sm:$0xf0] }
  0x66   : > { %v2675_v30 = vor.u32 %v2858_v24, %v2672_v25  ;;  %v2714_v24 = vld [vmem:[%s4148_s8 + $0x1a0] sm:$0xf]  ;;  %v2870_v25 = vld [vmem:[%s4148_s8 + $0x1b8] sm:$0xf0] }
  0x69   : > { %1238 = vmatpush.bf16.msra.mxu0 %v2810_v26 }
  0x6d   : > { %1239 = vmatpush.bf16.msra.mxu0 %v2809_v27 }
  0x71   : > { %1240 = vmatpush.bf16.msra.mxu0 %v2808_v28  ;;  %v2586_v28 = vld [vmem:[%s4148_s8 + $0xb0] sm:$0xf] }
  0x75   : > { %1241 = vmatpush.bf16.msra.mxu0 %v2807_v29  ;;  %v2840_v29 = vld [vmem:[%s4148_s8 + $0xc8] sm:$0xf0] }
  0x76   : > { %v2587_v39 = vor.u32 %v2840_v29, %v2586_v28  ;;  %v2560_v28 = vld [vmem:[%s4148_s8 + $0x94] sm:$0xf0]  ;;  %v2678_v29 = vld [vmem:[%s4148_s8 + $0x160] sm:$0xf] }
  0xb5   : > { %v920_v48 = vpop.f32.mrf.mxu0 }
  0xb6   : > { %v934_v52 = vpop.f32.mrf.mxu1  ;;  %v921_v59 = vadd.f32 %v2919_v57, %v920_v48 }
  0xb8   : > { %v935_v63 = vadd.f32 %v934_v52, %v921_v59  ;;  %v2861_v52 = vld [vmem:[%s4148_s8 + $0x170] sm:$0xf0] }
  0xb9   : > { %v2671_v54 = vor.u32 %v2861_v52, %v2670_v51  ;;  %v2559_v52 = vor.u32 %v2833_v44, %v2558_v43  ;;  %v2855_v43 = vld [vmem:[%s4148_s8 + $0x140] sm:$0xf0]  ;;  %v2852_v44 = vld [vmem:[%s4148_s8 + $0x12c] sm:$0xf] }
  0xbb   : > { %1648 = vmatpush.bf16.msrb.mxu2 %v2671_v54  ;;  %v2825_v54 = vld [vmem:[%s4148_s8 + $0x50] sm:$0xf0] }
  0xbd   : > { %v948_v53 = vpop.f32.mrf.mxu2  ;;  %v922_v60 = vpop.f32.mrf.mxu0 }
  0xbe   : > { %v936_v61 = vpop.f32.mrf.mxu1  ;;  %v962_v0 = vpop.f32.mrf.mxu3  ;;  %v923_v1 = vadd.f32 %v2919_v57, %v922_v60  ;;  %v949_v2 = vadd.f32 %v948_v53, %v935_v63  ;;  %v2667_v53 = vor.u32 %v2857_v46, %v2664_v50  ;;  %v2850_v57 = vld [vmem:[%s4148_s8 + $0x11c] sm:$0xf]  ;;  %v2636_v60 = vld [vmem:[%s4148_s8 + $0x134] sm:$0xf0]  ;;  %v2606_v63 = vld [vmem:[%s4148_s8 + $0xe0] sm:$0xf]  ;;  %v2873_v50 = vunpack.c.l.bf16 %v2872_v37 }
  0xbf   : > { %v2844_v46 = vld [vmem:[%s4148_s8 + $0xec] sm:$0xf] }
  0xc0   : > { %v937_v3 = vadd.f32 %v936_v61, %v923_v1  ;;  %v963_v6 = vadd.f32 %v962_v0, %v949_v2  ;;  %v2642_v61 = vld [vmem:[%s4148_s8 + $0x120] sm:$0xf]  ;;  %v2635_v1 = vor.u32 %v2853_v56, %v2634_v55  ;;  %v2846_v2 = vld [vmem:[%s4148_s8 + $0xf8] sm:$0xf0]  ;;  %1634 = vmatpush.bf16.msra.mxu3 %v2667_v53  ;;  %v2522_v53 = vld [vmem:[%s4148_s8 + $0x38] sm:$0xf] }
  0xc1   : > { %v2822_v55 = vld [vmem:[%s4148_s8 + $0x3c] sm:$0xf] }
  0xc2   : > { %1621 = vmatpush.bf16.msra.mxu1 %v2635_v1 }
  0xc5   : > { %v950_v62 = vpop.f32.mrf.mxu2 }
  0xc6   : > { %v951_v8 = vadd.f32 %v950_v62, %v937_v3  ;;  %v964_v10 = vpop.f32.mrf.mxu3  ;;  %v2854_v62 = vld [vmem:[%s4148_s8 + $0x138] sm:$0xf0]  ;;  %v2843_v3 = vld [vmem:[%s4148_s8 + $0xe4] sm:$0xf] }
  0xc8   : > { %v965_v11 = vadd.f32 %v964_v10, %v951_v8  ;;  %v2847_v8 = vld [vmem:[%s4148_s8 + $0x100] sm:$0xf0]  ;;  %v2700_v10 = vld [vmem:[%s4148_s8 + $0x1ac] sm:$0xf0] }
  0xcd   : > { %v1004_v7 = vpop.f32.mrf.mxu2 }
  0xd5   : > { %v976_v4 = vpop.f32.mrf.mxu0  ;;  %v1006_v18 = vpop.f32.mrf.mxu2 }
  0xd6   : > { %v990_v5 = vpop.f32.mrf.mxu1  ;;  %v977_v9 = vadd.f32 %v976_v4, %v963_v6  ;;  %v2639_v4 = vor.u32 %v2850_v57, %v2636_v60  ;;  %v2608_v6 = vld [vmem:[%s4148_s8 + $0xfc] sm:$0xf0]  ;;  %v2524_v57 = vld [vmem:[%s4148_s8 + $0x54] sm:$0xf0]  ;;  %v2826_v60 = vld [vmem:[%s4148_s8 + $0x58] sm:$0xf0] }
  0xd7   : > { %v2527_v1 = vor.u32 %v2822_v55, %v2524_v57  ;;  %v2845_v57 = vld [vmem:[%s4148_s8 + $0xf4] sm:$0xf] }
  0xd8   : > { %v991_v12 = vadd.f32 %v990_v5, %v977_v9  ;;  %v2643_v5 = vor.u32 %v2854_v62, %v2642_v61  ;;  %v2865_v9 = vld [vmem:[%s4148_s8 + $0x194] sm:$0xf]  ;;  %1635 = vmatpush.bf16.msra.mxu3 %v2639_v4  ;;  %v2619_v61 = vor.u32 %v2844_v46, %v2616_v49  ;;  %v2874_v62 = vunpack.c.h.bf16 %v2872_v37  ;;  %v2818_v4 = vld [vmem:[%s4148_s8 + $0x18] sm:$0xf0]  ;;  %v2863_v37 = vld [vmem:[%s4148_s8 + $0x180] sm:$0xf0] }
  0xd9   : > { %v2658_v49 = vld [vmem:[%s4148_s8 + $0x130] sm:$0xf] }
  0xda   : > { %v1005_v16 = vadd.f32 %v1004_v7, %v991_v12  ;;  %v2614_v7 = vld [vmem:[%s4148_s8 + $0xe8] sm:$0xf]  ;;  %1649 = vmatpush.bf16.msrb.mxu2 %v2643_v5 }
  0xdc   : > { %v1009_v20 = vmax.f32 %v1005_v16, 0.0 }
  0xdd   : > { %v978_v13 = vpop.f32.mrf.mxu0 }
  0xde   : > { %v979_v14 = vadd.f32 %v978_v13, %v965_v11  ;;  %v992_v15 = vpop.f32.mrf.mxu1 }
  0xe0   : > { %v993_v17 = vadd.f32 %v992_v15, %v979_v14  ;;  %v2703_v14 = vor.u32 %v2865_v9, %v2700_v10  ;;  %v2502_v9 = vld [vmem:[%s4148_s8 + $0x8] sm:$0xf]  ;;  %v2819_v10 = vld [vmem:[%s4148_s8 + $0x20] sm:$0xf0] }
  0xe2   : > { %v1007_v19 = vadd.f32 %v1006_v18, %v993_v17  ;;  %v2607_v17 = vor.u32 %v2846_v2, %v2606_v63  ;;  %v2578_v18 = vld [vmem:[%s4148_s8 + $0xa8] sm:$0xf]  ;;  %1661 = vmatpush.bf16.msrb.mxu0 %v2703_v14  ;;  %v2523_v63 = vor.u32 %v2825_v54, %v2522_v53  ;;  %v2622_v54 = vld [vmem:[%s4148_s8 + $0xf0] sm:$0xf] }
  0xe3   : > { %v2504_v53 = vld [vmem:[%s4148_s8 + $0x24] sm:$0xf0] }
  0xe4   : > { %v1010_v21 = vmax.f32 %v1007_v19, 0.0  ;;  %v2839_v19 = vld [vmem:[%s4148_s8 + $0xc0] sm:$0xf0]  ;;  %1622 = vmatpush.bf16.msra.mxu1 %v2607_v17 }
  0xe5   : > { %v2579_v34 = vor.u32 %v2839_v19, %v2578_v18  ;;  %v2837_v18 = vld [vmem:[%s4148_s8 + $0xb4] sm:$0xf] }
  0xe6   : > { %v1027_v22 = vpack.c.bf16 %v1010_v21, %v1009_v20  ;;  %v2836_v20 = vld [vmem:[%s4148_s8 + $0xac] sm:$0xf]  ;;  %v2611_v21 = vor.u32 %v2843_v3, %v2608_v6  ;;  %1662 = vmatpush.bf16.msrb.mxu0 %v2675_v30  ;;  %v2494_v3 = vld [vmem:[%s4148_s8] sm:$0xf]  ;;  %v2815_v6 = vld [vmem:[%s4148_s8 + $0x4] sm:$0xf] }
  0xe7   : > { %v2583_v38 = vor.u32 %v2836_v20, %v2580_v23  ;;  %v2869_v19 = vld [vmem:[%s4148_s8 + $0x1b0] sm:$0xf0]  ;;  %v2866_v20 = vld [vmem:[%s4148_s8 + $0x19c] sm:$0xf] }
  0xe8   : > { %1122 = vmatmul.bf16.vlgmr.msrb.gmra.mxu3 %v1027_v22  ;;  %1136 = vmatmul.bf16.vlgmr.msra.gmra.mxu2 %v1027_v22  ;;  %v2615_v22 = vor.u32 %v2847_v8, %v2614_v7  ;;  %v2496_v7 = vld [vmem:[%s4148_s8 + $0x1c] sm:$0xf0] }
  0xe9   : > { %1636 = vmatpush.bf16.msra.mxu3 %v2611_v21  ;;  %1623 = vmatpush.bf16.msra.mxu1 %v2579_v34  ;;  %v2499_v14 = vor.u32 %v2815_v6, %v2496_v7  ;;  %v2708_v21 = vld [vmem:[%s4148_s8 + $0x1b4] sm:$0xf0]  ;;  %v2602_v6 = vld [vmem:[%s4148_s8 + $0xc0] sm:$0xf]  ;;  %v2842_v7 = vld [vmem:[%s4148_s8 + $0xd8] sm:$0xf0] }
  0xea   : > { %1650 = vmatpush.bf16.msrb.mxu2 %v2615_v22  ;;  %1663 = vmatpush.bf16.msrb.mxu0 %v2647_v45  ;;  %v2711_v23 = vor.u32 %v2866_v20, %v2708_v21  ;;  %v2652_v45 = vld [vmem:[%s4148_s8 + $0x144] sm:$0xf0]  ;;  %v2546_v21 = vld [vmem:[%s4148_s8 + $0x50] sm:$0xf] }
  0xeb   : > { %v2540_v20 = vld [vmem:[%s4148_s8 + $0x64] sm:$0xf0] }
  0xed   : > { %1637 = vmatpush.bf16.msra.mxu3 %v2583_v38  ;;  %v2687_v38 = vor.u32 %v2863_v37, %v2686_v36  ;;  %v2920_v36 = vld [vmem:[%s4147_s7] ss:$0 sm:$0xff] }
  0xee   : > { %1651 = vmatpush.bf16.msrb.mxu2 %v2587_v39  ;;  %1664 = vmatpush.bf16.msrb.mxu0 %v2619_v61  ;;  %v2823_v39 = vld [vmem:[%s4148_s8 + $0x44] sm:$0xf] }
  0xf2   : > { %1652 = vmatpush.bf16.msrb.mxu2 %v2559_v52  ;;  %v2816_v52 = vld [vmem:[%s4148_s8 + $0xc] sm:$0xf] }
  0xf3   : > { %v2507_v55 = vor.u32 %v2816_v52, %v2504_v53 }
 0x16b   : > { %v1123_v40 = vpop.f32.mrf.mxu3  ;;  %v1137_v41 = vpop.f32.mrf.mxu2 }
 0x16c   : > { %v3488_v47 = vadd.f32 %v1123_v40, %v1030_v31  ;;  %v1138_v48 = vadd.f32 %v1137_v41, %v1031_v32  ;;  %v2829_v40 = vld [vmem:[%s4148_s8 + $0x74] sm:$0xf]  ;;  %v2552_v41 = vld [vmem:[%s4148_s8 + $0x8c] sm:$0xf0] }
 0x16d   : > { %v2555_v51 = vor.u32 %v2829_v40, %v2552_v41  ;;  %v2532_v40 = vld [vmem:[%s4148_s8 + $0x5c] sm:$0xf0]  ;;  %v2650_v41 = vld [vmem:[%s4148_s8 + $0x128] sm:$0xf] }
 0x16e   : > { %v1142_v58 = vmax.f32 %v3488_v47, 0.0  ;;  %v1143_v59 = vmax.f32 %v1138_v48, 0.0  ;;  %v2588_v47 = vld [vmem:[%s4148_s8 + $0xcc] sm:$0xf0]  ;;  %v2651_v46 = vor.u32 %v2855_v43, %v2650_v41  ;;  %v3843_v43 = vld [vmem:[%s4149_s9] sm:$0x7f] }
 0x16f   : > { %1638 = vmatpush.bf16.msra.mxu3 %v2555_v51  ;;  %v1318_v52 = vperm.slane %v3843_v43, 1 }
 0x170   : > { %1147 = vst.msk [vmem:[%s3504_s18] sm:$0xff] %vm1146_vm1, %v1142_v58  ;;  %v1155_v0 = vmul.f32 0.5, %v1143_v59 }
 0x171   : > { %1149 = vst.msk [vmem:[%s3521_s16] sm:$0xff] %vm1146_vm1, %v1143_v59  ;;  %v2530_v59 = vld [vmem:[%s4148_s8 + $0x40] sm:$0xf] }
 0x172   : > { %v1157_v11 = vmul.f32 1.442695, %v1155_v0  ;;  %v2531_v2 = vor.u32 %v2826_v60, %v2530_v59  ;;  %v2624_v59 = vld [vmem:[%s4148_s8 + $0x10c] sm:$0xf0] }
 0x173   : > { %v1125_v12 = vpop.f32.mrf.mxu3  ;;  %v1139_v13 = vpop.f32.mrf.mxu2  ;;  %1639 = vmatpush.bf16.msra.mxu3 %v2527_v1  ;;  %v2627_v61 = vor.u32 %v2845_v57, %v2624_v59  ;;  %v2594_v1 = vld [vmem:[%s4148_s8 + $0xb8] sm:$0xf] }
 0x174   : > { %v3563_v15 = vadd.f32 %v1125_v12, %v1030_v31  ;;  %v1140_v16 = vadd.f32 %v1139_v13, %v1031_v32  ;;  %v2550_v31 = vld [vmem:[%s4148_s8 + $0x70] sm:$0xf]  ;;  %v2832_v32 = vld [vmem:[%s4148_s8 + $0x88] sm:$0xf0]  ;;  %2921 = vpow2.f32 %v1157_v11  ;;  %v2495_v11 = vor.u32 %v2818_v4, %v2494_v3  ;;  %1653 = vmatpush.bf16.msrb.mxu2 %v2531_v2  ;;  %v2841_v2 = vld [vmem:[%s4148_s8 + $0xd0] sm:$0xf0] }
 0x175   : > { %v2551_v48 = vor.u32 %v2832_v32, %v2550_v31  ;;  %v2862_v31 = vld [vmem:[%s4148_s8 + $0x178] sm:$0xf0]  ;;  %v2859_v32 = vld [vmem:[%s4148_s8 + $0x164] sm:$0xf]  ;;  %v2595_v4 = vor.u32 %v2841_v2, %v2594_v1 }
 0x176   : > { %v1144_v26 = vmax.f32 %v3563_v15, 0.0  ;;  %v1145_v27 = vmax.f32 %v1140_v16, 0.0  ;;  %v2503_v16 = vor.u32 %v2819_v10, %v2502_v9  ;;  %v2591_v15 = vor.u32 %v2837_v18, %v2588_v47  ;;  %v2838_v3 = vld [vmem:[%s4148_s8 + $0xbc] sm:$0xf]  ;;  %v2566_v10 = vld [vmem:[%s4148_s8 + $0x80] sm:$0xf] }
 0x177   : > { %1624 = vmatpush.bf16.msra.mxu1 %v2551_v48  ;;  %1640 = vmatpush.bf16.msra.mxu3 %v2499_v14  ;;  %v2679_v34 = vor.u32 %v2862_v31, %v2678_v29  ;;  %v2655_v48 = vor.u32 %v2852_v44, %v2652_v45  ;;  %v2603_v9 = vor.u32 %v2842_v7, %v2602_v6  ;;  %v2574_v14 = vld [vmem:[%s4148_s8 + $0x88] sm:$0xf]  ;;  %v2512_v29 = vld [vmem:[%s4148_s8 + $0x2c] sm:$0xf0]  ;;  %v2821_v31 = vld [vmem:[%s4148_s8 + $0x30] sm:$0xf0] }
 0x178   : > { %1148 = vst.msk [vmem:[%s3504_s18 + $0x8] sm:$0xff] %vm1146_vm1, %v1144_v26  ;;  %v1156_v33 = vmul.f32 0.5, %v1145_v27  ;;  %1654 = vmatpush.bf16.msrb.mxu2 %v2503_v16  ;;  %1665 = vmatpush.bf16.msrb.mxu0 %v2591_v15  ;;  %v2835_v16 = vld [vmem:[%s4148_s8 + $0xa0] sm:$0xf0]  ;;  %v2538_v47 = vld [vmem:[%s4148_s8 + $0x48] sm:$0xf] }
 0x179   : > { %1150 = vst.msk [vmem:[%s3521_s16 + $0x8] sm:$0xff] %vm1146_vm1, %v1145_v27  ;;  %v2830_v27 = vld [vmem:[%s4148_s8 + $0x7c] sm:$0xf]  ;;  %v2827_v15 = vld [vmem:[%s4148_s8 + $0x60] sm:$0xf0]  ;;  %v1317_v44 = vperm.slane %v3843_v43, 0 }
 0x17a   : > { %v1159_v42 = vmul.f32 1.442695, %v1156_v33  ;;  %v2922_v56 = vpop.eup %2921  ;;  %v2563_v30 = vor.u32 %v2830_v27, %v2560_v28  ;;  %v2680_v33 = vld [vmem:[%s4148_s8 + $0x17c] sm:$0xf0]  ;;  %v2820_v27 = vld [vmem:[%s4148_s8 + $0x28] sm:$0xf0] }
 0x17b   : > { %v1161_v0 = vmul.f32 %v2922_v56, %v2873_v50  ;;  %1625 = vmatpush.bf16.msra.mxu1 %v2523_v63  ;;  %1689 = vmatpush.bf16.msrb.mxu3 %v2711_v23  ;;  %v2683_v35 = vor.u32 %v2859_v32, %v2680_v33  ;;  %v2856_v50 = vld [vmem:[%s4148_s8 + $0x148] sm:$0xf0]  ;;  %v2849_v63 = vld [vmem:[%s4148_s8 + $0x110] sm:$0xf0]  ;;  %v2539_v23 = vor.u32 %v2827_v15, %v2538_v47  ;;  %v1320_v45 = vperm.slane %v3843_v43, 3  ;;  %s2877_s18 = smul.u32 56, %s3133_s25 }
 0x17c   : > { %2923 = vpow2.f32 %v1159_v42  ;;  %1666 = vmatpush.bf16.msrb.mxu0 %v2563_v30  ;;  %v2535_v42 = vor.u32 %v2823_v39, %v2532_v40  ;;  %v2659_v51 = vor.u32 %v2856_v50, %v2658_v49  ;;  %v2848_v56 = vld [vmem:[%s4148_s8 + $0x108] sm:$0xf0]  ;;  %v2817_v28 = vld [vmem:[%s4148_s8 + $0x14] sm:$0xf]  ;;  %v2518_v30 = vld [vmem:[%s4148_s8 + $0x18] sm:$0xf] }
 0x17d   : > { %v1163_v12 = vadd.f32 %v1161_v0, %v1142_v58  ;;  %v2706_v58 = vld [vmem:[%s4148_s8 + $0x198] sm:$0xf]  ;;  %v2623_v60 = vor.u32 %v2848_v56, %v2622_v54  ;;  %v2515_v33 = vor.u32 %v2817_v28, %v2512_v29  ;;  %v1319_v54 = vperm.slane %v3843_v43, 2  ;;  %s2023_s28 = scalar_lea.hbm %s4150_s10, %s2877_s18 }
 0x17e   : > { %v2707_v22 = vor.u32 %v2869_v19, %v2706_v58  ;;  %v2575_v58 = vor.u32 %v2835_v16, %v2574_v14  ;;  %v2824_v19 = vld [vmem:[%s4148_s8 + $0x4c] sm:$0xf]  ;;  %v1321_v16 = vperm.slane %v3843_v43, 4  ;;  %s2026_s29 = sshll.u32 %s2023_s28, 4  ;;  %s2027_s29 = int_to_ptr.hbm [resolvable:$true] %s2026_s29 }
 0x17f   : > { %1626 = vmatpush.bf16.msra.mxu1 %v2495_v11  ;;  %1690 = vmatpush.bf16.msrb.mxu3 %v2683_v35  ;;  %v2834_v11 = vld [vmem:[%s4148_s8 + $0x98] sm:$0xf0]  ;;  %s2995_s16 = sshra.s32 %s2027_s29, 4  ;;  %s2996_s16 = int_to_ptr.hbm [resolvable:$true] %s2995_s16 }
 0x180   : > { %1667 = vmatpush.bf16.msrb.mxu0 %v2535_v42  ;;  %s2997_s23 = scalar_lea.hbm %s2996_s16, 56  ;;  %p3002_p0 = scmp.lt.s32.totalorder %s2996_s16, %s4150_s10 }
 0x181   : > { %p2998_p11 = scmp.ne.s32.totalorder %s2996_s16, %s2997_s23  ;;  %p3003_p1 = scmp.lt.s32.totalorder %s3001_s14, %s2997_s23 }
 0x182   : > { %v2924_v5 = vpop.eup %2923 }
 0x183   : > { %v1162_v8 = vmul.f32 %v2924_v5, %v2874_v62  ;;  %1675 = vmatpush.bf16.msrb.mxu1 %v2707_v22  ;;  %1691 = vmatpush.bf16.msrb.mxu3 %v2655_v48  ;;  %v2630_v62 = vld [vmem:[%s4148_s8 + $0xf8] sm:$0xf]  ;;  %v2828_v22 = vld [vmem:[%s4148_s8 + $0x68] sm:$0xf0]  ;;  %p2999_p12 = pnand %p2998_p11, %p3150_p5  ;;  %p3004_p2 = por %p3003_p1, %p3002_p0 }
 0x184   : > { %1668 = vmatpush.bf16.msrb.mxu0 %v2507_v55  ;;  %v2631_v0 = vor.u32 %v2849_v63, %v2630_v62  ;;  %v2596_v5 = vld [vmem:[%s4148_s8 + $0xd4] sm:$0xf0] }
 0x185   : > { %v1164_v13 = vadd.f32 %v1162_v8, %v1144_v26  ;;  %v2715_v26 = vor.u32 %v2870_v25, %v2714_v24  ;;  %v2599_v8 = vor.u32 %v2838_v3, %v2596_v5  ;;  %v2543_v24 = vor.u32 %v2824_v19, %v2540_v20  ;;  %v2510_v25 = vld [vmem:[%s4148_s8 + $0x10] sm:$0xf]  ;;  %p3000_p13 = pneg %p2999_p12 }
 0x186   : > { %v2511_v32 = vor.u32 %v2820_v27, %v2510_v25 }
 0x187   : > { %v1181_v17 = vpack.c.bf16 %v1164_v13, %v1163_v12  ;;  %1703 = vmatpush.bf16.msra.mxu2 %v2715_v26  ;;  %1676 = vmatpush.bf16.msrb.mxu1 %v2679_v34  ;;  %v2831_v12 = vld [vmem:[%s4148_s8 + $0x84] sm:$0xf]  ;;  %v2568_v13 = vld [vmem:[%s4148_s8 + $0x9c] sm:$0xf0]  ;;  %v2547_v26 = vor.u32 %v2828_v22, %v2546_v21  ;;  %v2519_v34 = vor.u32 %v2821_v31, %v2518_v30  ;;  %p3005_p3 = pnand %p3004_p2, %p3000_p13 }
 0x188   : > { %1692 = vmatpush.bf16.msrb.mxu3 %v2627_v61  ;;  %v2571_v18 = vor.u32 %v2831_v12, %v2568_v13 }
 0x189   : > { %1242 = vmatmul.bf16.vlgmr.msra.gmra.mxu0 %v1181_v17  ;;  %v2567_v17 = vor.u32 %v2834_v11, %v2566_v10 }
 0x18b   : > { %1704 = vmatpush.bf16.msra.mxu2 %v2687_v38  ;;  %1677 = vmatpush.bf16.msrb.mxu1 %v2651_v46 }
 0x18c   : > { %1693 = vmatpush.bf16.msrb.mxu3 %v2599_v8 }
 0x18f   : > { %1705 = vmatpush.bf16.msra.mxu2 %v2659_v51  ;;  %1678 = vmatpush.bf16.msrb.mxu1 %v2623_v60 }
 0x190   : > { %1694 = vmatpush.bf16.msrb.mxu3 %v2571_v18 }
 0x193   : > { %1706 = vmatpush.bf16.msra.mxu2 %v2631_v0  ;;  %1679 = vmatpush.bf16.msrb.mxu1 %v2595_v4 }
 0x194   : > { %1695 = vmatpush.bf16.msrb.mxu3 %v2543_v24 }
 0x197   : > { %1707 = vmatpush.bf16.msra.mxu2 %v2603_v9  ;;  %1680 = vmatpush.bf16.msrb.mxu1 %v2567_v17 }
 0x198   : > { %1696 = vmatpush.bf16.msrb.mxu3 %v2515_v33  ;;  %v1322_v33 = vperm.slane %v3843_v43, 5 }
 0x19b   : > { %1708 = vmatpush.bf16.msra.mxu2 %v2575_v58  ;;  %1681 = vmatpush.bf16.msrb.mxu1 %v2539_v23 }
 0x19f   : > { %1709 = vmatpush.bf16.msra.mxu2 %v2547_v26  ;;  %1682 = vmatpush.bf16.msrb.mxu1 %v2511_v32 }
 0x1a3   : > { %1710 = vmatpush.bf16.msra.mxu2 %v2519_v34  ;;  %v1323_v34 = vperm.slane %v3843_v43, 6 }
 0x206   : > { %v1243_v35 = vpop.f32.mrf.mxu0 }
 0x207   : > { %v1244_v37 = vadd.f32 %v2920_v36, %v1243_v35 }
 0x209   : > { %v1248_v40 = vmax.f32 %v1244_v37, 0.0 }
 0x20e   : > { %v1245_v38 = vpop.f32.mrf.mxu0 }
 0x20f   : > { %v1246_v39 = vadd.f32 %v2920_v36, %v1245_v38 }
 0x211   : > { %v1249_v41 = vmax.f32 %v1246_v39, 0.0 }
 0x213   : > { %v1314_v42 = vpack.c.bf16 %v1249_v41, %v1248_v40 }
 0x215   : > { %1627 = vmatmul.bf16.vlgmr.msra.gmra.mxu1 %v1314_v42  ;;  %1641 = vmatmul.bf16.vlgmr.msra.gmra.mxu3 %v1314_v42 }
 0x216   : > { %1655 = vmatmul.bf16.vlgmr.msrb.gmra.mxu2 %v1314_v42  ;;  %1669 = vmatmul.bf16.vlgmr.msrb.gmra.mxu0 %v1314_v42 }
 0x225   : > { %1683 = vmatmul.bf16.vlgmr.msrb.gmra.mxu1 %v1314_v42  ;;  %1697 = vmatmul.bf16.vlgmr.msrb.gmra.mxu3 %v1314_v42 }
 0x226   : > { %1711 = vmatmul.bf16.vlgmr.msra.gmra.mxu2 %v1314_v42 }
 0x292   : > { %v1628_v46 = vpop.f32.mrf.mxu1 }
 0x293   : > { %v1629_v48 = vadd.f32 %v1628_v46, %v1317_v44  ;;  %v1670_v49 = vpop.f32.mrf.mxu0 }
 0x294   : > { %v1671_v50 = vadd.f32 %v1670_v49, %v1320_v45 }
 0x295   : > { %v2716_v51 = vmul.f32 -1.442695, %v1629_v48 }
 0x296   : > { %v2719_v53 = vmul.f32 -1.442695, %v1671_v50 }
 0x297   : > { %2925 = vpow2.f32 %v2716_v51 }
 0x298   : > { %2927 = vpow2.f32 %v2719_v53  ;;  %v1642_v55 = vpop.f32.mrf.mxu3 }
 0x299   : > { %v1643_v56 = vadd.f32 %v1642_v55, %v1318_v52  ;;  %v1656_v57 = vpop.f32.mrf.mxu2 }
 0x29a   : > { %v1657_v59 = vadd.f32 %v1656_v57, %v1319_v54  ;;  %v1630_v60 = vpop.f32.mrf.mxu1 }
 0x29b   : > { %v2717_v61 = vmul.f32 -1.442695, %v1643_v56  ;;  %v1631_v62 = vadd.f32 %v1630_v60, %v1317_v44  ;;  %v1672_v63 = vpop.f32.mrf.mxu0 }
 0x29c   : > { %v2718_v0 = vmul.f32 -1.442695, %v1657_v59  ;;  %v1673_v1 = vadd.f32 %v1672_v63, %v1320_v45 }
 0x29d   : > { %v2926_v2 = vpop.eup %2925  ;;  %2929 = vpow2.f32 %v2717_v61  ;;  %v2723_v3 = vmul.f32 -1.442695, %v1631_v62 }
 0x29e   : > { %v2928_v4 = vpop.eup %2927  ;;  %v3849_v5 = vadd.f32 1.0, %v2926_v2  ;;  %2931 = vpow2.f32 %v2718_v0  ;;  %v2726_v6 = vmul.f32 -1.442695, %v1673_v1 }
 0x29f   : > { %v3851_v7 = vadd.f32 1.0, %v2928_v4  ;;  %2933 = vpow2.f32 %v2723_v3 }
 0x2a0   : > { %2935 = vrcp.f32 %v3849_v5  ;;  %v1644_v8 = vpop.f32.mrf.mxu3  ;;  %v1782_v21 = vand.u32 2147483647, %v3849_v5  ;;  %v1784_v22 = vand.u32 2147483648, %v3849_v5  ;;  %vm1778_vm2 = vweird.f32 %v3849_v5 }
 0x2a1   : > { %2937 = vrcp.f32 %v3851_v7  ;;  %v1645_v9 = vadd.f32 %v1644_v8, %v1318_v52  ;;  %v1658_v47 = vpop.f32.mrf.mxu2  ;;  %v1829_v24 = vand.u32 2147483648, %v3851_v7  ;;  %v1827_v30 = vand.u32 2147483647, %v3851_v7 }
 0x2a2   : > { %2939 = vpow2.f32 %v2726_v6  ;;  %v1684_v58 = vpop.f32.mrf.mxu1  ;;  %v1659_v27 = vadd.f32 %v1658_v47, %v1319_v54  ;;  %v1785_v36 = vor.u32 1.1754944e-38, %v1784_v22  ;;  %vm1823_vm3 = vweird.f32 %v3851_v7 }
 0x2a3   : > { %v2930_v10 = vpop.eup %2929  ;;  %v2724_v18 = vmul.f32 -1.442695, %v1645_v9  ;;  %v1685_v28 = vadd.f32 %v1684_v58, %v1321_v16  ;;  %vm3887_vm4 = vcmp.eq.f32.partialorder %v1782_v21, 8.507059e+37  ;;  %v1830_v40 = vor.u32 1.1754944e-38, %v1829_v24 }
 0x2a4   : > { %v2932_v11 = vpop.eup %2931  ;;  %v3855_v12 = vadd.f32 1.0, %v2930_v10  ;;  %v2725_v42 = vmul.f32 -1.442695, %v1659_v27  ;;  %vm3892_vm5 = vcmp.eq.f32.partialorder %v1827_v30, 8.507059e+37 }
 0x2a5   : > { %v2934_v13 = vpop.eup %2933  ;;  %v3857_v14 = vadd.f32 1.0, %v2932_v11  ;;  %v2720_v44 = vmul.f32 -1.442695, %v1685_v28 }
 0x2a6   : > { %v3860_v17 = vpop.eup %2935  ;;  %2941 = vrcp.f32 %v3855_v12  ;;  %v3873_v26 = vadd.f32 1.0, %v2934_v13  ;;  %vm1793_vm6 = vweird.f32 %v3855_v12  ;;  %v1797_v46 = vand.u32 2147483647, %v3855_v12 }
 0x2a7   : > { %v3863_v15 = vpop.eup %2937  ;;  %v1774_v19 = vmul.f32 %v3860_v17, %v3849_v5  ;;  %2943 = vrcp.f32 %v3857_v14  ;;  %vm1779_vm7 = vweird.f32 %v3860_v17  ;;  %v1799_v51 = vand.u32 2147483648, %v3855_v12 }
 0x2a8   : > { %v2940_v20 = vpop.eup %2939  ;;  %v1819_v23 = vmul.f32 %v3863_v15, %v3851_v7  ;;  %2945 = vpow2.f32 %v2724_v18  ;;  %v1698_v52 = vpop.f32.mrf.mxu3  ;;  %vm1824_vm8 = vweird.f32 %v3863_v15  ;;  %vm1808_vm9 = vweird.f32 %v3857_v14  ;;  %vm3916_vm11 = vmor %vm1778_vm2, %vm1779_vm7 }
 0x2a9   : > { %v1775_v25 = vsub.f32 1.0, %v1774_v19  ;;  %v3878_v31 = vadd.f32 1.0, %v2940_v20  ;;  %2947 = vrcp.f32 %v3873_v26  ;;  %v1712_v56 = vpop.f32.mrf.mxu2  ;;  %v1814_v60 = vand.u32 2147483648, %v3857_v14  ;;  %vm3934_vm13 = vmor %vm1823_vm3, %vm1824_vm8 }
 0x2aa   : > { %v1820_v29 = vsub.f32 1.0, %v1819_v23  ;;  %v1812_v0 = vand.u32 2147483647, %v3857_v14  ;;  %vm1798_vm14 = vcmp.eq.f32.partialorder %v1797_v46, 8.507059e+37  ;;  %v1800_v8 = vor.u32 1.1754944e-38, %v1799_v51  ;;  %v1686_v47 = vpop.f32.mrf.mxu1 }
 0x2ab   : > { %v1776_v32 = vmul.f32 %v3860_v17, %v1775_v25  ;;  %2949 = vrcp.f32 %v3878_v31  ;;  %v1815_v11 = vor.u32 1.1754944e-38, %v1814_v60  ;;  %v1699_v13 = vadd.f32 %v1698_v52, %v1322_v33 }
 0x2ac   : > { %v2942_v35 = vpop.eup %2941  ;;  %v1821_v37 = vmul.f32 %v3863_v15, %v1820_v29  ;;  %vm1813_vm1 = vcmp.eq.f32.partialorder %v1812_v0, 8.507059e+37  ;;  %v1713_v24 = vadd.f32 %v1712_v56, %v1323_v34  ;;  %v1687_v25 = vadd.f32 %v1686_v47, %v1321_v16 }
 0x2ad   : > { %v2944_v38 = vpop.eup %2943  ;;  %v1789_v41 = vmul.f32 %v2942_v35, %v3855_v12  ;;  %v1777_v49 = vadd.f32 %v3860_v17, %v1776_v32  ;;  %vm1794_vm10 = vweird.f32 %v2942_v35  ;;  %v2721_v23 = vmul.f32 -1.442695, %v1699_v13 }
 0x2ae   : > { %v1804_v48 = vmul.f32 %v2944_v38, %v3857_v14  ;;  %v2946_v53 = vpop.eup %2945  ;;  %v1822_v54 = vadd.f32 %v3863_v15, %v1821_v37  ;;  %vm1809_vm12 = vweird.f32 %v2944_v38  ;;  %vm1795_vm15 = vmor %vm1793_vm6, %vm1794_vm10  ;;  %vm1883_vm2 = vweird.f32 %v3873_v26 }
 0x2af   : > { %v1790_v50 = vsub.f32 1.0, %v1789_v41  ;;  %v3907_v57 = vpop.eup %2947  ;;  %v3910_v61 = vadd.f32 1.0, %v2946_v53  ;;  %v1781_v2 = vsel %vm3916_vm11, %v3860_v17, %v1777_v49  ;;  %vm1810_vm0 = vmor %vm1808_vm9, %vm1809_vm12  ;;  %v1887_v28 = vand.u32 2147483647, %v3873_v26 }
 0x2b0   : > { %v1805_v55 = vsub.f32 1.0, %v1804_v48  ;;  %v1879_v1 = vmul.f32 %v3907_v57, %v3873_v26  ;;  %v1826_v6 = vsel %vm3934_vm13, %v3863_v15, %v1822_v54  ;;  %v1786_v17 = vsel %vm3887_vm4, %v1785_v36, %v1781_v2  ;;  %v1700_v27 = vpop.f32.mrf.mxu3 }
 0x2b1   : > { %v1791_v59 = vmul.f32 %v2942_v35, %v1790_v50  ;;  %2951 = vrcp.f32 %v3910_v61  ;;  %v3939_v5 = vpop.eup %2949  ;;  %v1831_v58 = vsel %vm3892_vm5, %v1830_v40, %v1826_v6  ;;  %vm1884_vm3 = vweird.f32 %v3907_v57  ;;  %v1714_v30 = vpop.f32.mrf.mxu2 }
 0x2b2   : > { %v1806_v63 = vmul.f32 %v2944_v38, %v1805_v55  ;;  %v1880_v9 = vsub.f32 1.0, %v1879_v1  ;;  %2953 = vpow2.f32 %v2725_v42  ;;  %v1924_v14 = vmul.f32 %v3939_v5, %v3878_v31  ;;  %vm3987_vm5 = vmor %vm1883_vm2, %vm1884_vm3 }
 0x2b3   : > { %v1792_v4 = vadd.f32 %v2942_v35, %v1791_v59  ;;  %2955 = vpow2.f32 %v2720_v44  ;;  %v2722_v36 = vmul.f32 -1.442695, %v1713_v24  ;;  %v2727_v37 = vmul.f32 -1.442695, %v1687_v25 }
 0x2b4   : > { %v1807_v7 = vadd.f32 %v2944_v38, %v1806_v63  ;;  %v1881_v21 = vmul.f32 %v3907_v57, %v1880_v9  ;;  %2957 = vpow2.f32 %v2721_v23  ;;  %v1701_v40 = vadd.f32 %v1700_v27, %v1322_v33 }
 0x2b5   : > { %v1796_v10 = vsel %vm1795_vm15, %v2942_v35, %v1792_v4  ;;  %v1925_v35 = vsub.f32 1.0, %v1924_v14  ;;  %v1889_v41 = vand.u32 2147483648, %v3873_v26  ;;  %v1904_v42 = vand.u32 2147483648, %v3910_v61 }
 0x2b6   : > { %v1801_v18 = vsel %vm1798_vm14, %v1800_v8, %v1796_v10  ;;  %v1811_v12 = vsel %vm1810_vm0, %v2944_v38, %v1807_v7  ;;  %v1882_v38 = vadd.f32 %v3907_v57, %v1881_v21  ;;  %2959 = vpow2.f32 %v2722_v36 }
 0x2b7   : > { %v1983_v15 = vpack.c.bf16 %v1801_v18, %v1786_v17  ;;  %v1816_v19 = vsel %vm1813_vm1, %v1815_v11, %v1811_v12  ;;  %v2952_v22 = vpop.eup %2951  ;;  %v1715_v44 = vadd.f32 %v1714_v30, %v1323_v34  ;;  %v1902_v48 = vand.u32 2147483647, %v3910_v61 }
 0x2b8   : > { %v1984_v20 = vpack.c.bf16 %v1831_v58, %v1816_v19  ;;  %v1894_v29 = vmul.f32 %v2952_v22, %v3910_v61  ;;  %v2954_v32 = vpop.eup %2953  ;;  %vm1899_vm4 = vweird.f32 %v2952_v22  ;;  %v1926_v49 = vmul.f32 %v3939_v5, %v1925_v35 }
 0x2b9   : > { %1991 = vst [vmem:[%s3960_s26] sm:$0xff] %v1983_v15  ;;  %v3973_v16 = vadd.f32 1.0, %v2954_v32  ;;  %v2956_v45 = vpop.eup %2955  ;;  %v2728_v43 = vmul.f32 -1.442695, %v1701_v40  ;;  %v1886_v34 = vsel %vm3987_vm5, %v3907_v57, %v1882_v38  ;;  %vm1888_vm6 = vcmp.eq.f32.partialorder %v1887_v28, 8.507059e+37 }
 0x2ba   : > { %1992 = vst [vmem:[%s3960_s26 + $0x8] sm:$0xff] %v1984_v20  ;;  %v1895_v39 = vsub.f32 1.0, %v1894_v29  ;;  %v3992_v50 = vadd.f32 1.0, %v2956_v45  ;;  %vm1898_vm7 = vweird.f32 %v3910_v61  ;;  %v2958_v52 = vpop.eup %2957  ;;  %v1890_v26 = vor.u32 1.1754944e-38, %v1889_v41 }
 0x2bb   : > { %2961 = vrcp.f32 %v3973_v16  ;;  %vm1900_vm8 = vmor %vm1898_vm7, %vm1899_vm4  ;;  %v1905_v53 = vor.u32 1.1754944e-38, %v1904_v42  ;;  %v2729_v54 = vmul.f32 -1.442695, %v1715_v44  ;;  %vm1929_vm9 = vweird.f32 %v3939_v5 }
 0x2bc   : > { %v1896_v46 = vmul.f32 %v2952_v22, %v1895_v39  ;;  %2963 = vpow2.f32 %v2727_v37  ;;  %vm1903_vm10 = vcmp.eq.f32.partialorder %v1902_v48, 8.507059e+37  ;;  %v4000_v56 = vadd.f32 1.0, %v2958_v52  ;;  %v2960_v59 = vpop.eup %2959 }
 0x2bd   : > { %2965 = vrcp.f32 %v3992_v50  ;;  %v1891_v57 = vsel %vm1888_vm6, %v1890_v26, %v1886_v34  ;;  %v1927_v60 = vadd.f32 %v3939_v5, %v1926_v49  ;;  %v1934_v63 = vand.u32 2147483648, %v3878_v31 }
 0x2be   : > { %v1897_v51 = vadd.f32 %v2952_v22, %v1896_v46  ;;  %2967 = vpow2.f32 %v2728_v43  ;;  %vm1928_vm11 = vweird.f32 %v3878_v31  ;;  %v1932_v2 = vand.u32 2147483647, %v3878_v31 }
 0x2bf   : > { %2969 = vrcp.f32 %v4000_v56  ;;  %vm4010_vm12 = vmor %vm1928_vm11, %vm1929_vm9  ;;  %v1917_v6 = vand.u32 2147483647, %v3973_v16  ;;  %v4016_v8 = vadd.f32 1.0, %v2960_v59  ;;  %v1919_v11 = vand.u32 2147483648, %v3973_v16 }
 0x2c0   : > { %v1901_v55 = vsel %vm1900_vm8, %v2952_v22, %v1897_v51  ;;  %2971 = vpow2.f32 %v2729_v54  ;;  %v1931_v31 = vsel %vm4010_vm12, %v3939_v5, %v1927_v60  ;;  %v1935_v13 = vor.u32 1.1754944e-38, %v1934_v63 }
 0x2c1   : > { %v1906_v62 = vsel %vm1903_vm10, %v1905_v53, %v1901_v55  ;;  %v2962_v61 = vpop.eup %2961  ;;  %v1842_v18 = vand.u32 2147483647, %v3992_v50  ;;  %2973 = vrcp.f32 %v4016_v8  ;;  %vm1933_vm13 = vcmp.eq.f32.partialorder %v1932_v2, 8.507059e+37 }
 0x2c2   : > { %v1987_v0 = vpack.c.bf16 %v1906_v62, %v1891_v57  ;;  %v2964_v1 = vpop.eup %2963  ;;  %v1909_v3 = vmul.f32 %v2962_v61, %v3973_v16  ;;  %vm1914_vm14 = vweird.f32 %v2962_v61  ;;  %v1936_v15 = vsel %vm1933_vm13, %v1935_v13, %v1931_v31 }
 0x2c3   : > { %v4018_v7 = vadd.f32 1.0, %v2964_v1  ;;  %v4020_v9 = vpop.eup %2965  ;;  %vm1913_vm15 = vweird.f32 %v3973_v16  ;;  %vm4032_vm0 = vcmp.eq.f32.partialorder %v1917_v6, 8.507059e+37  ;;  %v1920_v21 = vor.u32 1.1754944e-38, %v1919_v11 }
 0x2c4   : > { %1996 = vst [vmem:[%s3960_s26 + $0x1c] sm:$0xff] %v1987_v0  ;;  %v1910_v10 = vsub.f32 1.0, %v1909_v3  ;;  %v1834_v17 = vmul.f32 %v4020_v9, %v3992_v50  ;;  %v2968_v12 = vpop.eup %2967  ;;  %vm1838_vm1 = vweird.f32 %v3992_v50  ;;  %vm1915_vm2 = vmor %vm1913_vm15, %vm1914_vm14  ;;  %vm4039_vm3 = vcmp.eq.f32.partialorder %v1842_v18, 8.507059e+37 }
 0x2c5   : > { %2975 = vrcp.f32 %v4018_v7  ;;  %v2970_v58 = vpop.eup %2969  ;;  %v1844_v25 = vand.u32 2147483648, %v3992_v50  ;;  %v1857_v27 = vand.u32 2147483647, %v4000_v56  ;;  %vm1839_vm4 = vweird.f32 %v4020_v9 }
 0x2c6   : > { %v1911_v47 = vmul.f32 %v2962_v61, %v1910_v10  ;;  %v1835_v19 = vsub.f32 1.0, %v1834_v17  ;;  %v2972_v14 = vpop.eup %2971  ;;  %v1849_v22 = vmul.f32 %v2970_v58, %v4000_v56  ;;  %v4046_v30 = vadd.f32 1.0, %v2968_v12  ;;  %vm4059_vm6 = vmor %vm1838_vm1, %vm1839_vm4 }
 0x2c7   : > { %v2974_v32 = vpop.eup %2973  ;;  %v1859_v37 = vand.u32 2147483648, %v4000_v56  ;;  %v4052_v38 = vadd.f32 1.0, %v2972_v14  ;;  %vm1854_vm5 = vweird.f32 %v2970_v58  ;;  %v1845_v44 = vor.u32 1.1754944e-38, %v1844_v25 }
 0x2c8   : > { %v1912_v20 = vadd.f32 %v2962_v61, %v1911_v47  ;;  %v1836_v23 = vmul.f32 %v4020_v9, %v1835_v19  ;;  %v1850_v29 = vsub.f32 1.0, %v1849_v22  ;;  %v1864_v41 = vmul.f32 %v2974_v32, %v4016_v8 }
 0x2c9   : > { %vm1853_vm7 = vweird.f32 %v4000_v56  ;;  %2977 = vrcp.f32 %v4046_v30  ;;  %vm1858_vm8 = vcmp.eq.f32.partialorder %v1857_v27, 8.507059e+37  ;;  %v1860_v49 = vor.u32 1.1754944e-38, %v1859_v37 }
 0x2ca   : > { %v1916_v28 = vsel %vm1915_vm2, %v2962_v61, %v1912_v20  ;;  %v1837_v36 = vadd.f32 %v4020_v9, %v1836_v23  ;;  %v1851_v40 = vmul.f32 %v2970_v58, %v1850_v29  ;;  %v1865_v33 = vsub.f32 1.0, %v1864_v41  ;;  %vm1855_vm9 = vmor %vm1853_vm7, %vm1854_vm5 }
 0x2cb   : > { %v1921_v35 = vsel %vm4032_vm0, %v1920_v21, %v1916_v28  ;;  %v4054_v39 = vpop.eup %2975  ;;  %v1874_v50 = vand.u32 2147483648, %v4016_v8  ;;  %2979 = vrcp.f32 %v4052_v38  ;;  %vm1869_vm10 = vweird.f32 %v2974_v32 }
 0x2cc   : > { %v1988_v16 = vpack.c.bf16 %v1936_v15, %v1921_v35  ;;  %v1939_v45 = vmul.f32 %v4054_v39, %v4018_v7  ;;  %v1841_v46 = vsel %vm4059_vm6, %v4020_v9, %v1837_v36  ;;  %v1852_v48 = vadd.f32 %v2970_v58, %v1851_v40 }
 0x2cd   : > { %v1866_v51 = vmul.f32 %v2974_v32, %v1865_v33  ;;  %v1872_v52 = vand.u32 2147483647, %v4016_v8  ;;  %v1846_v26 = vsel %vm4039_vm3, %v1845_v44, %v1841_v46  ;;  %vm1868_vm11 = vweird.f32 %v4016_v8 }
 0x2ce   : > { %1997 = vst [vmem:[%s3960_s26 + $0x24] sm:$0xff] %v1988_v16  ;;  %v1940_v43 = vsub.f32 1.0, %v1939_v45  ;;  %v1856_v34 = vsel %vm1855_vm9, %v2970_v58, %v1852_v48  ;;  %vm1870_vm12 = vmor %vm1868_vm11, %vm1869_vm10  ;;  %v1875_v57 = vor.u32 1.1754944e-38, %v1874_v50  ;;  %vm1994_vm14 = vcmask 125952  }
 0x2cf   : > { %v1861_v53 = vsel %vm1858_vm8, %v1860_v49, %v1856_v34  ;;  %v1867_v55 = vadd.f32 %v2974_v32, %v1866_v51  ;;  %v2978_v59 = vpop.eup %2977  ;;  %vm1873_vm13 = vcmp.eq.f32.partialorder %v1872_v52, 8.507059e+37  ;;  %vm1944_vm15 = vweird.f32 %v4054_v39 }
 0x2d0   : > { %v1985_v54 = vpack.c.bf16 %v1861_v53, %v1846_v26  ;;  %v1941_v56 = vmul.f32 %v4054_v39, %v1940_v43  ;;  %v1954_v62 = vmul.f32 %v2978_v59, %v4046_v30  ;;  %vm1943_vm0 = vweird.f32 %v4018_v7 }
 0x2d1   : > { %v1871_v60 = vsel %vm1870_vm12, %v2974_v32, %v1867_v55  ;;  %v2980_v61 = vpop.eup %2979  ;;  %v1947_v4 = vand.u32 2147483647, %v4018_v7  ;;  %v1949_v6 = vand.u32 2147483648, %v4018_v7  ;;  %v1964_v8 = vand.u32 2147483648, %v4046_v30  ;;  %vm4093_vm2 = vmor %vm1943_vm0, %vm1944_vm15 }
 0x2d2   : > { %1993 = vst [vmem:[%s3960_s26 + $0x10] sm:$0xff] %v1985_v54  ;;  %v1876_v63 = vsel %vm1873_vm13, %v1875_v57, %v1871_v60  ;;  %v1942_v1 = vadd.f32 %v4054_v39, %v1941_v56  ;;  %v1955_v2 = vsub.f32 1.0, %v1954_v62  ;;  %v1969_v3 = vmul.f32 %v2980_v61, %v4052_v38 }
 0x2d3   : > { %v1986_v0 = vpack.c.bf16 %v1876_v63, %v1876_v63  ;;  %vm1959_vm1 = vweird.f32 %v2978_v59  ;;  %v1962_v31 = vand.u32 2147483647, %v4046_v30  ;;  %vm1958_vm3 = vweird.f32 %v4046_v30 }
 0x2d4   : > { %v1956_v9 = vmul.f32 %v2978_v59, %v1955_v2  ;;  %v1970_v10 = vsub.f32 1.0, %v1969_v3  ;;  %v1977_v7 = vand.u32 2147483647, %v4052_v38  ;;  %v1979_v13 = vand.u32 2147483648, %v4052_v38  ;;  %vm1960_vm6 = vmor %vm1958_vm3, %vm1959_vm1 }
 0x2d5   : > { %1995 = vst.msk [vmem:[%s3960_s26 + $0x18] sm:$0xf] %vm1994_vm14, %v1986_v0  ;;  %v1946_v17 = vsel %vm4093_vm2, %v4054_v39, %v1942_v1  ;;  %vm1974_vm4 = vweird.f32 %v2980_v61  ;;  %vm1948_vm5 = vcmp.eq.f32.partialorder %v1947_v4, 8.507059e+37  ;;  %v1950_v47 = vor.u32 1.1754944e-38, %v1949_v6 }
 0x2d6   : > { %v1957_v18 = vadd.f32 %v2978_v59, %v1956_v9  ;;  %v1971_v12 = vmul.f32 %v2980_v61, %v1970_v10  ;;  %v1965_v58 = vor.u32 1.1754944e-38, %v1964_v8  ;;  %vm1963_vm7 = vcmp.eq.f32.partialorder %v1962_v31, 8.507059e+37 }
 0x2d7   : > { %vm1973_vm8 = vweird.f32 %v4052_v38  ;;  %v1951_v19 = vsel %vm1948_vm5, %v1950_v47, %v1946_v17  ;;  %v1980_v20 = vor.u32 1.1754944e-38, %v1979_v13  ;;  %vm1978_vm10 = vcmp.eq.f32.partialorder %v1977_v7, 8.507059e+37 }
 0x2d8   : > { %v1961_v15 = vsel %vm1960_vm6, %v2978_v59, %v1957_v18  ;;  %v1972_v5 = vadd.f32 %v2980_v61, %v1971_v12  ;;  %vm1975_vm9 = vmor %vm1973_vm8, %vm1974_vm4 }
 0x2d9   : > { %v1966_v14 = vsel %vm1963_vm7, %v1965_v58, %v1961_v15 }
 0x2da   : > { %v1989_v21 = vpack.c.bf16 %v1966_v14, %v1951_v19  ;;  %v1976_v22 = vsel %vm1975_vm9, %v2980_v61, %v1972_v5 }
 0x2db   : > { %v1981_v23 = vsel %vm1978_vm10, %v1980_v20, %v1976_v22 }
 0x2dc   : > { %1998 = vst [vmem:[%s3960_s26 + $0x2c] sm:$0xff] %v1989_v21  ;;  %v1990_v24 = vpack.c.bf16 %v1981_v23, %v1981_v23 }
 0x2de   : > { %1999 = vst.msk [vmem:[%s3960_s26 + $0x34] sm:$0xf] %vm1994_vm14, %v1990_v24 }
 0x2df   : > { %3008 = shalt.err (!%p3005_p3)
}
 0x2e0   : > { %s3045_s27 = smov 448   ;;  %s3046_s26 = smov 28  }
 0x2e1   : > { %2878 = dma.vmem_to_hbm [thread:$0]  (%p3150_p5), %s2025_s30, 896, %s2027_s29, %s2001_s15, %s3045_s27, %s3045_s27, %s3046_s26  }
 0x2e2 PF: > { %p2884_p4 = scmp.ge.s32.totalorder %s3043_s24, 2  ;;  %s2049_s19 = sand.u32 1, %s3031_s21  }
 0x2e3   : > { %s2050_s28 = scalar_lea.sflag [#allocation3], %s2049_s19 }
 0x2e4   : > { %p2881_p7 = pnand %p2884_p4, %p3154_p6 }
 0x2e6   : > { %p2882_p8 = pneg %p2881_p7 }
 0x2e8   : > { %3026 = dma.done.wait (%p2882_p8), %s2050_s28, 896  }
 0x2e9   : > { %3028 = vsyncadd (%p2882_p8), %s2050_s28, 4294966400  ;;  %s4186_s24 = sld [smem:[#allocation6_spill]]  ;;  %s4189_s21 = smov %s3035_s22 }
 0x2ea   : > { %s4187_s16 = sld [smem:[#allocation5_spill]] }
 0x2eb   : > { %s4188_s23 = sld [smem:[#allocation7_spill]] }
 0x2ef   : > { %p23_p9 = scmp.ge.s32.totalorder %s4186_s24, 4  }
 0x2f0   : > { %s4190_s22 = smov %s4187_s16 }
 0x2f1   :  { %25 = sbr.rel (!%p23_p9) target bundleno = 5 (0x5), region = 122 }
 0x2f6   :  { %2072 = vsyncpa [#allocation3], 1 }
 0x2f7   :  { %2074 = vsyncpa [#allocation3 + $0x1], 1 }

</bundles_post_ra>
